<compile_context>
chip_gen: v6e
topology: v6e:2x2x1
jax: 0.10.0
libtpu: 0.0.40
codegen_flags: <defaults>
</compile_context>

<pallas_src>
import functools

import jax
import jax.numpy as jnp
from jax.experimental import pallas as pl
from jax.experimental.pallas import tpu as pltpu


def _erf(x):
    # Abramowitz & Stegun 7.1.26 polynomial (abs err ~1.5e-7); exp + reciprocal only,
    # which map onto the EUP.  nn.GELU() in PyTorch is the exact (erf) GELU.
    a1, a2, a3, a4, a5 = 0.254829592, -0.284496736, 1.421413741, -1.453152027, 1.061405429
    p = 0.3275911
    sign = jnp.where(x >= 0.0, 1.0, -1.0)
    ax = jnp.abs(x)
    t = pl.reciprocal(1.0 + p * ax)              # exact reciprocal on the EUP path
    poly = ((((a5 * t + a4) * t + a3) * t + a2) * t + a1) * t
    return sign * (1.0 - poly * jnp.exp(-ax * ax))


def _gelu_exact(x):
    return 0.5 * x * (1.0 + _erf(x * 0.7071067811865476))


def _attention_kernel(x_ref, ln_g_ref, ln_b_ref, wqkv_ref, bqkv_ref,
                      wo_ref, bo_ref, out_ref, wsum_ref, *, num_heads, head_dim):
    x = x_ref[0]                                   # (L, D) f32
    L, D = x.shape

    # LayerNorm(dim, eps=1e-6, elementwise_affine=True) in f32.
    mu = jnp.mean(x, axis=-1, keepdims=True)
    xc = x - mu
    var = jnp.mean(xc * xc, axis=-1, keepdims=True)
    xn = xc * jax.lax.rsqrt(var + 1e-6) * ln_g_ref[...] + ln_b_ref[...]

    # Fused QKV projection (PyTorch MHA in_proj): bf16 operands, f32 accumulation.
    # wqkv_ref is (D, 3D) with the Q third pre-scaled by 1/sqrt(head_dim) on the host.
    qkv = jax.lax.dot_general(xn.astype(jnp.bfloat16), wqkv_ref[...],
                              (((1,), (0,)), ((), ())),
                              preferred_element_type=jnp.float32) + bqkv_ref[...]
    q = qkv[:, 0 * D:1 * D].astype(jnp.bfloat16)
    k = qkv[:, 1 * D:2 * D].astype(jnp.bfloat16)
    v = qkv[:, 2 * D:3 * D].astype(jnp.bfloat16)

    out_acc = jnp.zeros((L, D), jnp.float32)       # projected output accumulator
    wsum_acc = jnp.zeros((1, L), jnp.float32)      # sum over (heads, queries) of attn probs

    for h in range(num_heads):                     # static slices only
        lo = h * head_dim
        qh = q[:, lo:lo + head_dim]
        kh = k[:, lo:lo + head_dim]
        vh = v[:, lo:lo + head_dim]
        s = jax.lax.dot_general(qh, kh, (((1,), (1,)), ((), ())),
                                preferred_element_type=jnp.float32)       # (L, L), pre-scaled
        s = s - jnp.max(s, axis=-1, keepdims=True)
        e = jnp.exp(s)
        p = e * pl.reciprocal(jnp.sum(e, axis=-1, keepdims=True), approx=True)
        wsum_acc = wsum_acc + jnp.sum(p, axis=0, keepdims=True)           # (1, L)
        oh = jnp.dot(p.astype(jnp.bfloat16), vh,
                     preferred_element_type=jnp.float32)                  # (L, hd)
        out_acc = out_acc + jax.lax.dot_general(                          # += oh @ Wo[h]
            oh.astype(jnp.bfloat16), wo_ref[h],
            (((1,), (0,)), ((), ())), preferred_element_type=jnp.float32)

    out_ref[0] = out_acc + bo_ref[...]
    # head-averaged attention weights, summed over the query axis -> (1, L)
    wsum_ref[0] = wsum_acc * (1.0 / num_heads)


def _mlp_kernel(y_ref, ln_g_ref, ln_b_ref, w1_ref, b1_ref, w2_ref, b2_ref,
                z_ref, yn_ref):
    # grid = (batch, hidden_tile); the output block is resident across the hidden axis
    # and used directly as the f32 accumulator.
    j = pl.program_id(1)

    @pl.when(j == 0)
    def _():
        y = y_ref[0]                               # (K, D) f32
        mu = jnp.mean(y, axis=-1, keepdims=True)   # LayerNorm(dim), eps=1e-5
        yc = y - mu
        var = jnp.mean(yc * yc, axis=-1, keepdims=True)
        yn = yc * jax.lax.rsqrt(var + 1e-5) * ln_g_ref[...] + ln_b_ref[...]
        yn_ref[...] = yn.astype(jnp.bfloat16)      # stash normalized tokens once per batch
        z_ref[0] = y + b2_ref[...]                 # residual + final bias; partials add on top

    h = jax.lax.dot_general(yn_ref[...], w1_ref[...], (((1,), (0,)), ((), ())),
                            preferred_element_type=jnp.float32) + b1_ref[...]   # (K, th)
    h = _gelu_exact(h)
    z_ref[0] = z_ref[0] + jax.lax.dot_general(h.astype(jnp.bfloat16), w2_ref[...],
                                              (((1,), (0,)), ((), ())),
                                              preferred_element_type=jnp.float32)


def block_forward(x, fp, *, num_heads, keep_eta):
    B, L, D = x.shape
    head_dim = D // num_heads
    hidden = fp["mlp_w1"].shape[1]

    # --- F: attention sub-block (one grid step per batch element) ---
    out, wsum = pl.pallas_call(
        functools.partial(_attention_kernel, num_heads=num_heads, head_dim=head_dim),
        grid=(B,),
        in_specs=[
            pl.BlockSpec((1, L, D), lambda b: (b, 0, 0)),
            pl.BlockSpec((1, D), lambda b: (0, 0)),
            pl.BlockSpec((1, D), lambda b: (0, 0)),
            pl.BlockSpec((D, 3 * D), lambda b: (0, 0)),
            pl.BlockSpec((1, 3 * D), lambda b: (0, 0)),
            pl.BlockSpec((num_heads, head_dim, D), lambda b: (0, 0, 0)),
            pl.BlockSpec((1, D), lambda b: (0, 0)),
        ],
        out_specs=(
            pl.BlockSpec((1, L, D), lambda b: (b, 0, 0)),
            pl.BlockSpec((1, 1, L), lambda b: (b, 0, 0)),
        ),
        out_shape=(
            jax.ShapeDtypeStruct((B, L, D), jnp.float32),
            jax.ShapeDtypeStruct((B, 1, L), jnp.float32),
        ),
        compiler_params=pltpu.CompilerParams(dimension_semantics=("parallel",)),
    )(x, fp["ln1_g"], fp["ln1_b"], fp["w_qkv"], fp["b_qkv"], fp["w_out"], fp["b_out"])

    wsum = wsum[:, 0, :]                                     # (B, L)
    keep = int(keep_eta * L)
    # NOTE: keep == 0 (tiny L / eta) would give a degenerate (B, 0, D) block, exactly
    # as the PyTorch code would; no guard added, preserving the reference semantics.

    # torch.topk(..., sorted=False) leaves order unspecified; value-sorted is valid.
    _, idx = jax.lax.top_k(wsum, keep)                       # (B, keep)
    idx3 = jnp.broadcast_to(idx[:, :, None], (B, keep, D))   # unsqueeze(2).repeat(...,D)
    y = (jnp.take_along_axis(out, idx3, axis=1)
         + jnp.take_along_axis(x, idx3, axis=1))             # (B, keep, D)

    # --- G: MLP sub-block + residual, hidden dimension tiled across the grid ---
    th = hidden if (hidden <= 512 or hidden % 512 != 0) else 512
    n_ht = hidden // th
    z = pl.pallas_call(
        _mlp_kernel,
        grid=(B, n_ht),
        in_specs=[
            pl.BlockSpec((1, keep, D), lambda b, j: (b, 0, 0)),
            pl.BlockSpec((1, D), lambda b, j: (0, 0)),
            pl.BlockSpec((1, D), lambda b, j: (0, 0)),
            pl.BlockSpec((D, th), lambda b, j: (0, j)),
            pl.BlockSpec((1, th), lambda b, j: (0, j)),
            pl.BlockSpec((th, D), lambda b, j: (j, 0)),
            pl.BlockSpec((1, D), lambda b, j: (0, 0)),
        ],
        out_specs=pl.BlockSpec((1, keep, D), lambda b, j: (b, 0, 0)),
        out_shape=jax.ShapeDtypeStruct((B, keep, D), jnp.float32),
        scratch_shapes=[pltpu.VMEM((keep, D), jnp.bfloat16)],
        compiler_params=pltpu.CompilerParams(
            dimension_semantics=("parallel", "arbitrary")),
    )(y, fp["ln2_g"], fp["ln2_b"], fp["mlp_w1"], fp["mlp_b1"], fp["mlp_w2"], fp["mlp_b2"])
    return z


def init_params(key, dim, mlp_ratio=4):
    """PyTorch-layout parameters: Linear weights are (out_features, in_features)."""
    ks = jax.random.split(key, 6)
    s_in = 1.0 / (dim ** 0.5)
    return {
        # AttentionSubBlock: LayerNorm(dim, eps=1e-6) + MHA(dim, num_heads)
        "ln1_g": jnp.ones((1, dim), jnp.float32),
        "ln1_b": jnp.zeros((1, dim), jnp.float32),
        "w_qkv": s_in * jax.random.normal(ks[0], (3 * dim, dim), jnp.float32),
        "b_qkv": 0.02 * jax.random.normal(ks[1], (1, 3 * dim), jnp.float32),
        "w_out": s_in * jax.random.normal(ks[2], (dim, dim), jnp.float32),
        "b_out": jnp.zeros((1, dim), jnp.float32),
        # MLPSubblock: LayerNorm(dim) + Linear(dim, 4*dim) + GELU + Linear(4*dim, dim)
        "ln2_g": jnp.ones((1, dim), jnp.float32),
        "ln2_b": jnp.zeros((1, dim), jnp.float32),
        "mlp_w1": s_in * jax.random.normal(ks[3], (mlp_ratio * dim, dim), jnp.float32),
        "mlp_b1": 0.02 * jax.random.normal(ks[4], (1, mlp_ratio * dim), jnp.float32),
        "mlp_w2": (1.0 / ((mlp_ratio * dim) ** 0.5))
                  * jax.random.normal(ks[5], (dim, mlp_ratio * dim), jnp.float32),
        "mlp_b2": jnp.zeros((1, dim), jnp.float32),
    }


def prepare_params(params, *, num_heads):
    """One-time host-side prep: transpose to (in, out), fold the 1/sqrt(head_dim)
    scale into the Q projection, reshape W_out per head, cast weights to bf16."""
    D = params["ln1_g"].shape[-1]
    head_dim = D // num_heads
    scale = 1.0 / (head_dim ** 0.5)

    q_scale = jnp.concatenate([jnp.full((D,), scale, jnp.float32),
                               jnp.ones((2 * D,), jnp.float32)])
    wqkv_t = (params["w_qkv"] * q_scale[:, None]).T          # (D, 3D), Q rows pre-scaled
    bqkv = params["b_qkv"] * q_scale[None, :]                # (1, 3D)
    wo_heads = params["w_out"].T.reshape(num_heads, head_dim, D)

    return {
        "ln1_g": params["ln1_g"], "ln1_b": params["ln1_b"],
        "w_qkv": wqkv_t.astype(jnp.bfloat16), "b_qkv": bqkv,
        "w_out": wo_heads.astype(jnp.bfloat16), "b_out": params["b_out"],
        "ln2_g": params["ln2_g"], "ln2_b": params["ln2_b"],
        "mlp_w1": params["mlp_w1"].T.astype(jnp.bfloat16),   # (D, hidden)
        "mlp_b1": params["mlp_b1"],
        "mlp_w2": params["mlp_w2"].T.astype(jnp.bfloat16),   # (hidden, D)
        "mlp_b2": params["mlp_b2"],
    }


if __name__ == "__main__":
    B, L, D = 2, 8, 32
    num_heads = 4
    keep_eta = 0.5      # keeps int(0.5 * 8) = 4 tokens per sequence

    key = jax.random.PRNGKey(0)
    kx, kp = jax.random.split(key)
    x = jax.random.normal(kx, (B, L, D), dtype=jnp.float32)
    params = init_params(kp, D)
    fparams = prepare_params(params, num_heads=num_heads)

    # TODO(synk): the original forward contains an ipdb.set_trace() breakpoint; omitted.
    fwd = jax.jit(functools.partial(block_forward, num_heads=num_heads, keep_eta=keep_eta))
    z = fwd(x, fparams)
    jax.block_until_ready(z)
    assert z.shape == (B, int(keep_eta * L), D) and z.dtype == jnp.float32
    print("KERNEL_OK")
</pallas_src>

<mosaic_0001>
module attributes {stable_mosaic.version = 11 : i64} {
  func.func @_attention_kernel(%arg0: i32, %arg1: memref<1x8x32xf32, #tpu.memory_space<vmem>>, %arg2: memref<1x32xf32, #tpu.memory_space<vmem>>, %arg3: memref<1x32xf32, #tpu.memory_space<vmem>>, %arg4: memref<32x96xbf16, #tpu.memory_space<vmem>>, %arg5: memref<1x96xf32, #tpu.memory_space<vmem>>, %arg6: memref<4x8x32xbf16, #tpu.memory_space<vmem>>, %arg7: memref<1x32xf32, #tpu.memory_space<vmem>>, %arg8: memref<1x8x32xf32, #tpu.memory_space<vmem>>, %arg9: memref<1x1x8xf32, #tpu.memory_space<vmem>>) attributes {dimension_semantics = [#tpu.dimension_semantics<parallel>], iteration_bounds = array<i64: 2>, scalar_prefetch = 0 : i64, scratch_operands = 0 : i64, tpu.core_type = #tpu.core_type<tc>, window_params = [{transform_indices = @transform_0, window_bounds = array<i64: 1, 8, 32>}, {pipeline_mode = #tpu.pipeline_mode<synchronous>, transform_indices = @transform_1, window_bounds = array<i64: 1, 32>}, {pipeline_mode = #tpu.pipeline_mode<synchronous>, transform_indices = @transform_2, window_bounds = array<i64: 1, 32>}, {pipeline_mode = #tpu.pipeline_mode<synchronous>, transform_indices = @transform_3, window_bounds = array<i64: 32, 96>}, {pipeline_mode = #tpu.pipeline_mode<synchronous>, transform_indices = @transform_4, window_bounds = array<i64: 1, 96>}, {pipeline_mode = #tpu.pipeline_mode<synchronous>, transform_indices = @transform_5, window_bounds = array<i64: 4, 8, 32>}, {pipeline_mode = #tpu.pipeline_mode<synchronous>, transform_indices = @transform_6, window_bounds = array<i64: 1, 32>}, {transform_indices = @transform_7, window_bounds = array<i64: 1, 8, 32>}, {transform_indices = @transform_8, window_bounds = array<i64: 1, 1, 8>}]} {
    %c0 = arith.constant 0 : index
    %c0_0 = arith.constant 0 : index
    %c0_1 = arith.constant 0 : index
    %0 = vector.load %arg1[%c0, %c0_0, %c0_1] : memref<1x8x32xf32, #tpu.memory_space<vmem>>, vector<1x8x32xf32>
    %1 = vector.shape_cast %0 : vector<1x8x32xf32> to vector<8x32xf32>
    %cst = arith.constant dense<0.000000e+00> : vector<8xf32>
    %2 = vector.multi_reduction <add>, %1, %cst [1] : vector<8x32xf32> to vector<8xf32>
    %3 = vector.shape_cast %2 : vector<8xf32> to vector<8x1xf32>
    %cst_2 = arith.constant 3.200000e+01 : f32
    %4 = vector.broadcast %cst_2 : f32 to vector<8x1xf32>
    %5 = arith.divf %3, %4 : vector<8x1xf32>
    %6 = vector.broadcast %5 : vector<8x1xf32> to vector<8x32xf32>
    %7 = arith.subf %1, %6 : vector<8x32xf32>
    %8 = arith.mulf %7, %7 : vector<8x32xf32>
    %cst_3 = arith.constant dense<0.000000e+00> : vector<8xf32>
    %9 = vector.multi_reduction <add>, %8, %cst_3 [1] : vector<8x32xf32> to vector<8xf32>
    %10 = vector.shape_cast %9 : vector<8xf32> to vector<8x1xf32>
    %cst_4 = arith.constant 3.200000e+01 : f32
    %11 = vector.broadcast %cst_4 : f32 to vector<8x1xf32>
    %12 = arith.divf %10, %11 : vector<8x1xf32>
    %cst_5 = arith.constant 9.99999997E-7 : f32
    %13 = vector.broadcast %cst_5 : f32 to vector<8x1xf32>
    %14 = arith.addf %12, %13 : vector<8x1xf32>
    %15 = math.rsqrt %14 : vector<8x1xf32>
    %16 = vector.broadcast %15 : vector<8x1xf32> to vector<8x32xf32>
    %17 = arith.mulf %7, %16 : vector<8x32xf32>
    %c0_6 = arith.constant 0 : index
    %c0_7 = arith.constant 0 : index
    %18 = vector.load %arg2[%c0_6, %c0_7] : memref<1x32xf32, #tpu.memory_space<vmem>>, vector<1x32xf32>
    %19 = vector.broadcast %18 : vector<1x32xf32> to vector<8x32xf32>
    %20 = arith.mulf %17, %19 : vector<8x32xf32>
    %c0_8 = arith.constant 0 : index
    %c0_9 = arith.constant 0 : index
    %21 = vector.load %arg3[%c0_8, %c0_9] : memref<1x32xf32, #tpu.memory_space<vmem>>, vector<1x32xf32>
    %22 = vector.broadcast %21 : vector<1x32xf32> to vector<8x32xf32>
    %23 = arith.addf %20, %22 : vector<8x32xf32>
    %24 = arith.truncf %23 : vector<8x32xf32> to vector<8x32xbf16>
    %c0_10 = arith.constant 0 : index
    %c0_11 = arith.constant 0 : index
    %25 = vector.load %arg4[%c0_10, %c0_11] : memref<32x96xbf16, #tpu.memory_space<vmem>>, vector<32x96xbf16>
    %cst_12 = arith.constant dense<0.000000e+00> : vector<8x96xf32>
    %26 = tpu.matmul %24, %25, %cst_12 {dimension_numbers = #tpu.dot_dimension_numbers<[1], [0], [0], [1], [0, 0, 1, 1], [], []>} : vector<8x32xbf16>, vector<32x96xbf16>, vector<8x96xf32> -> vector<8x96xf32>
    %c0_13 = arith.constant 0 : index
    %c0_14 = arith.constant 0 : index
    %27 = vector.load %arg5[%c0_13, %c0_14] : memref<1x96xf32, #tpu.memory_space<vmem>>, vector<1x96xf32>
    %28 = vector.broadcast %27 : vector<1x96xf32> to vector<8x96xf32>
    %29 = arith.addf %26, %28 : vector<8x96xf32>
    %30 = vector.extract_strided_slice %29 {offsets = [0, 0], sizes = [8, 32], strides = [1, 1]} : vector<8x96xf32> to vector<8x32xf32>
    %31 = arith.truncf %30 : vector<8x32xf32> to vector<8x32xbf16>
    %32 = vector.extract_strided_slice %29 {offsets = [0, 32], sizes = [8, 32], strides = [1, 1]} : vector<8x96xf32> to vector<8x32xf32>
    %33 = arith.truncf %32 : vector<8x32xf32> to vector<8x32xbf16>
    %34 = vector.extract_strided_slice %29 {offsets = [0, 64], sizes = [8, 32], strides = [1, 1]} : vector<8x96xf32> to vector<8x32xf32>
    %35 = arith.truncf %34 : vector<8x32xf32> to vector<8x32xbf16>
    %cst_15 = arith.constant 0.000000e+00 : f32
    %36 = vector.broadcast %cst_15 : f32 to vector<8x32xf32>
    %cst_16 = arith.constant 0.000000e+00 : f32
    %37 = vector.broadcast %cst_16 : f32 to vector<1x8xf32>
    %38 = vector.extract_strided_slice %31 {offsets = [0, 0], sizes = [8, 8], strides = [1, 1]} : vector<8x32xbf16> to vector<8x8xbf16>
    %39 = vector.extract_strided_slice %33 {offsets = [0, 0], sizes = [8, 8], strides = [1, 1]} : vector<8x32xbf16> to vector<8x8xbf16>
    %40 = vector.extract_strided_slice %35 {offsets = [0, 0], sizes = [8, 8], strides = [1, 1]} : vector<8x32xbf16> to vector<8x8xbf16>
    %cst_17 = arith.constant dense<0.000000e+00> : vector<8x8xf32>
    %41 = tpu.matmul %38, %39, %cst_17 {dimension_numbers = #tpu.dot_dimension_numbers<[1], [1], [0], [0], [0, 0, 1, 0], [], []>} : vector<8x8xbf16>, vector<8x8xbf16>, vector<8x8xf32> -> vector<8x8xf32>
    %cst_18 = arith.constant dense<0xFF800000> : vector<8xf32>
    %42 = vector.multi_reduction <maximumf>, %41, %cst_18 [1] : vector<8x8xf32> to vector<8xf32>
    %43 = vector.shape_cast %42 : vector<8xf32> to vector<8x1xf32>
    %44 = vector.broadcast %43 : vector<8x1xf32> to vector<8x8xf32>
    %45 = arith.subf %41, %44 : vector<8x8xf32>
    %46 = math.exp %45 : vector<8x8xf32>
    %cst_19 = arith.constant dense<0.000000e+00> : vector<8xf32>
    %47 = vector.multi_reduction <add>, %46, %cst_19 [1] : vector<8x8xf32> to vector<8xf32>
    %48 = vector.shape_cast %47 : vector<8xf32> to vector<8x1xf32>
    %49 = tpu.reciprocal %48 {approx = true} : vector<8x1xf32> -> vector<8x1xf32>
    %50 = vector.broadcast %49 : vector<8x1xf32> to vector<8x8xf32>
    %51 = arith.mulf %46, %50 : vector<8x8xf32>
    %cst_20 = arith.constant dense<0.000000e+00> : vector<8xf32>
    %52 = vector.multi_reduction <add>, %51, %cst_20 [0] : vector<8x8xf32> to vector<8xf32>
    %53 = vector.shape_cast %52 : vector<8xf32> to vector<1x8xf32>
    %54 = arith.addf %37, %53 : vector<1x8xf32>
    %55 = arith.truncf %51 : vector<8x8xf32> to vector<8x8xbf16>
    %cst_21 = arith.constant dense<0.000000e+00> : vector<8x8xf32>
    %56 = tpu.matmul %55, %40, %cst_21 {dimension_numbers = #tpu.dot_dimension_numbers<[1], [0], [0], [1], [0, 0, 1, 1], [], []>} : vector<8x8xbf16>, vector<8x8xbf16>, vector<8x8xf32> -> vector<8x8xf32>
    %57 = arith.truncf %56 : vector<8x8xf32> to vector<8x8xbf16>
    %c0_22 = arith.constant 0 : index
    %c0_23 = arith.constant 0 : index
    %c0_24 = arith.constant 0 : index
    %58 = vector.load %arg6[%c0_22, %c0_23, %c0_24] : memref<4x8x32xbf16, #tpu.memory_space<vmem>>, vector<1x8x32xbf16>
    %59 = vector.shape_cast %58 : vector<1x8x32xbf16> to vector<8x32xbf16>
    %cst_25 = arith.constant dense<0.000000e+00> : vector<8x32xf32>
    %60 = tpu.matmul %57, %59, %cst_25 {dimension_numbers = #tpu.dot_dimension_numbers<[1], [0], [0], [1], [0, 0, 1, 1], [], []>} : vector<8x8xbf16>, vector<8x32xbf16>, vector<8x32xf32> -> vector<8x32xf32>
    %61 = arith.addf %36, %60 : vector<8x32xf32>
    %62 = vector.extract_strided_slice %31 {offsets = [0, 8], sizes = [8, 8], strides = [1, 1]} : vector<8x32xbf16> to vector<8x8xbf16>
    %63 = vector.extract_strided_slice %33 {offsets = [0, 8], sizes = [8, 8], strides = [1, 1]} : vector<8x32xbf16> to vector<8x8xbf16>
    %64 = vector.extract_strided_slice %35 {offsets = [0, 8], sizes = [8, 8], strides = [1, 1]} : vector<8x32xbf16> to vector<8x8xbf16>
    %cst_26 = arith.constant dense<0.000000e+00> : vector<8x8xf32>
    %65 = tpu.matmul %62, %63, %cst_26 {dimension_numbers = #tpu.dot_dimension_numbers<[1], [1], [0], [0], [0, 0, 1, 0], [], []>} : vector<8x8xbf16>, vector<8x8xbf16>, vector<8x8xf32> -> vector<8x8xf32>
    %cst_27 = arith.constant dense<0xFF800000> : vector<8xf32>
    %66 = vector.multi_reduction <maximumf>, %65, %cst_27 [1] : vector<8x8xf32> to vector<8xf32>
    %67 = vector.shape_cast %66 : vector<8xf32> to vector<8x1xf32>
    %68 = vector.broadcast %67 : vector<8x1xf32> to vector<8x8xf32>
    %69 = arith.subf %65, %68 : vector<8x8xf32>
    %70 = math.exp %69 : vector<8x8xf32>
    %cst_28 = arith.constant dense<0.000000e+00> : vector<8xf32>
    %71 = vector.multi_reduction <add>, %70, %cst_28 [1] : vector<8x8xf32> to vector<8xf32>
    %72 = vector.shape_cast %71 : vector<8xf32> to vector<8x1xf32>
    %73 = tpu.reciprocal %72 {approx = true} : vector<8x1xf32> -> vector<8x1xf32>
    %74 = vector.broadcast %73 : vector<8x1xf32> to vector<8x8xf32>
    %75 = arith.mulf %70, %74 : vector<8x8xf32>
    %cst_29 = arith.constant dense<0.000000e+00> : vector<8xf32>
    %76 = vector.multi_reduction <add>, %75, %cst_29 [0] : vector<8x8xf32> to vector<8xf32>
    %77 = vector.shape_cast %76 : vector<8xf32> to vector<1x8xf32>
    %78 = arith.addf %54, %77 : vector<1x8xf32>
    %79 = arith.truncf %75 : vector<8x8xf32> to vector<8x8xbf16>
    %cst_30 = arith.constant dense<0.000000e+00> : vector<8x8xf32>
    %80 = tpu.matmul %79, %64, %cst_30 {dimension_numbers = #tpu.dot_dimension_numbers<[1], [0], [0], [1], [0, 0, 1, 1], [], []>} : vector<8x8xbf16>, vector<8x8xbf16>, vector<8x8xf32> -> vector<8x8xf32>
    %81 = arith.truncf %80 : vector<8x8xf32> to vector<8x8xbf16>
    %c1 = arith.constant 1 : index
    %c0_31 = arith.constant 0 : index
    %c0_32 = arith.constant 0 : index
    %82 = vector.load %arg6[%c1, %c0_31, %c0_32] : memref<4x8x32xbf16, #tpu.memory_space<vmem>>, vector<1x8x32xbf16>
    %83 = vector.shape_cast %82 : vector<1x8x32xbf16> to vector<8x32xbf16>
    %cst_33 = arith.constant dense<0.000000e+00> : vector<8x32xf32>
    %84 = tpu.matmul %81, %83, %cst_33 {dimension_numbers = #tpu.dot_dimension_numbers<[1], [0], [0], [1], [0, 0, 1, 1], [], []>} : vector<8x8xbf16>, vector<8x32xbf16>, vector<8x32xf32> -> vector<8x32xf32>
    %85 = arith.addf %61, %84 : vector<8x32xf32>
    %86 = vector.extract_strided_slice %31 {offsets = [0, 16], sizes = [8, 8], strides = [1, 1]} : vector<8x32xbf16> to vector<8x8xbf16>
    %87 = vector.extract_strided_slice %33 {offsets = [0, 16], sizes = [8, 8], strides = [1, 1]} : vector<8x32xbf16> to vector<8x8xbf16>
    %88 = vector.extract_strided_slice %35 {offsets = [0, 16], sizes = [8, 8], strides = [1, 1]} : vector<8x32xbf16> to vector<8x8xbf16>
    %cst_34 = arith.constant dense<0.000000e+00> : vector<8x8xf32>
    %89 = tpu.matmul %86, %87, %cst_34 {dimension_numbers = #tpu.dot_dimension_numbers<[1], [1], [0], [0], [0, 0, 1, 0], [], []>} : vector<8x8xbf16>, vector<8x8xbf16>, vector<8x8xf32> -> vector<8x8xf32>
    %cst_35 = arith.constant dense<0xFF800000> : vector<8xf32>
    %90 = vector.multi_reduction <maximumf>, %89, %cst_35 [1] : vector<8x8xf32> to vector<8xf32>
    %91 = vector.shape_cast %90 : vector<8xf32> to vector<8x1xf32>
    %92 = vector.broadcast %91 : vector<8x1xf32> to vector<8x8xf32>
    %93 = arith.subf %89, %92 : vector<8x8xf32>
    %94 = math.exp %93 : vector<8x8xf32>
    %cst_36 = arith.constant dense<0.000000e+00> : vector<8xf32>
    %95 = vector.multi_reduction <add>, %94, %cst_36 [1] : vector<8x8xf32> to vector<8xf32>
    %96 = vector.shape_cast %95 : vector<8xf32> to vector<8x1xf32>
    %97 = tpu.reciprocal %96 {approx = true} : vector<8x1xf32> -> vector<8x1xf32>
    %98 = vector.broadcast %97 : vector<8x1xf32> to vector<8x8xf32>
    %99 = arith.mulf %94, %98 : vector<8x8xf32>
    %cst_37 = arith.constant dense<0.000000e+00> : vector<8xf32>
    %100 = vector.multi_reduction <add>, %99, %cst_37 [0] : vector<8x8xf32> to vector<8xf32>
    %101 = vector.shape_cast %100 : vector<8xf32> to vector<1x8xf32>
    %102 = arith.addf %78, %101 : vector<1x8xf32>
    %103 = arith.truncf %99 : vector<8x8xf32> to vector<8x8xbf16>
    %cst_38 = arith.constant dense<0.000000e+00> : vector<8x8xf32>
    %104 = tpu.matmul %103, %88, %cst_38 {dimension_numbers = #tpu.dot_dimension_numbers<[1], [0], [0], [1], [0, 0, 1, 1], [], []>} : vector<8x8xbf16>, vector<8x8xbf16>, vector<8x8xf32> -> vector<8x8xf32>
    %105 = arith.truncf %104 : vector<8x8xf32> to vector<8x8xbf16>
    %c2 = arith.constant 2 : index
    %c0_39 = arith.constant 0 : index
    %c0_40 = arith.constant 0 : index
    %106 = vector.load %arg6[%c2, %c0_39, %c0_40] : memref<4x8x32xbf16, #tpu.memory_space<vmem>>, vector<1x8x32xbf16>
    %107 = vector.shape_cast %106 : vector<1x8x32xbf16> to vector<8x32xbf16>
    %cst_41 = arith.constant dense<0.000000e+00> : vector<8x32xf32>
    %108 = tpu.matmul %105, %107, %cst_41 {dimension_numbers = #tpu.dot_dimension_numbers<[1], [0], [0], [1], [0, 0, 1, 1], [], []>} : vector<8x8xbf16>, vector<8x32xbf16>, vector<8x32xf32> -> vector<8x32xf32>
    %109 = arith.addf %85, %108 : vector<8x32xf32>
    %110 = vector.extract_strided_slice %31 {offsets = [0, 24], sizes = [8, 8], strides = [1, 1]} : vector<8x32xbf16> to vector<8x8xbf16>
    %111 = vector.extract_strided_slice %33 {offsets = [0, 24], sizes = [8, 8], strides = [1, 1]} : vector<8x32xbf16> to vector<8x8xbf16>
    %112 = vector.extract_strided_slice %35 {offsets = [0, 24], sizes = [8, 8], strides = [1, 1]} : vector<8x32xbf16> to vector<8x8xbf16>
    %cst_42 = arith.constant dense<0.000000e+00> : vector<8x8xf32>
    %113 = tpu.matmul %110, %111, %cst_42 {dimension_numbers = #tpu.dot_dimension_numbers<[1], [1], [0], [0], [0, 0, 1, 0], [], []>} : vector<8x8xbf16>, vector<8x8xbf16>, vector<8x8xf32> -> vector<8x8xf32>
    %cst_43 = arith.constant dense<0xFF800000> : vector<8xf32>
    %114 = vector.multi_reduction <maximumf>, %113, %cst_43 [1] : vector<8x8xf32> to vector<8xf32>
    %115 = vector.shape_cast %114 : vector<8xf32> to vector<8x1xf32>
    %116 = vector.broadcast %115 : vector<8x1xf32> to vector<8x8xf32>
    %117 = arith.subf %113, %116 : vector<8x8xf32>
    %118 = math.exp %117 : vector<8x8xf32>
    %cst_44 = arith.constant dense<0.000000e+00> : vector<8xf32>
    %119 = vector.multi_reduction <add>, %118, %cst_44 [1] : vector<8x8xf32> to vector<8xf32>
    %120 = vector.shape_cast %119 : vector<8xf32> to vector<8x1xf32>
    %121 = tpu.reciprocal %120 {approx = true} : vector<8x1xf32> -> vector<8x1xf32>
    %122 = vector.broadcast %121 : vector<8x1xf32> to vector<8x8xf32>
    %123 = arith.mulf %118, %122 : vector<8x8xf32>
    %cst_45 = arith.constant dense<0.000000e+00> : vector<8xf32>
    %124 = vector.multi_reduction <add>, %123, %cst_45 [0] : vector<8x8xf32> to vector<8xf32>
    %125 = vector.shape_cast %124 : vector<8xf32> to vector<1x8xf32>
    %126 = arith.addf %102, %125 : vector<1x8xf32>
    %127 = arith.truncf %123 : vector<8x8xf32> to vector<8x8xbf16>
    %cst_46 = arith.constant dense<0.000000e+00> : vector<8x8xf32>
    %128 = tpu.matmul %127, %112, %cst_46 {dimension_numbers = #tpu.dot_dimension_numbers<[1], [0], [0], [1], [0, 0, 1, 1], [], []>} : vector<8x8xbf16>, vector<8x8xbf16>, vector<8x8xf32> -> vector<8x8xf32>
    %129 = arith.truncf %128 : vector<8x8xf32> to vector<8x8xbf16>
    %c3 = arith.constant 3 : index
    %c0_47 = arith.constant 0 : index
    %c0_48 = arith.constant 0 : index
    %130 = vector.load %arg6[%c3, %c0_47, %c0_48] : memref<4x8x32xbf16, #tpu.memory_space<vmem>>, vector<1x8x32xbf16>
    %131 = vector.shape_cast %130 : vector<1x8x32xbf16> to vector<8x32xbf16>
    %cst_49 = arith.constant dense<0.000000e+00> : vector<8x32xf32>
    %132 = tpu.matmul %129, %131, %cst_49 {dimension_numbers = #tpu.dot_dimension_numbers<[1], [0], [0], [1], [0, 0, 1, 1], [], []>} : vector<8x8xbf16>, vector<8x32xbf16>, vector<8x32xf32> -> vector<8x32xf32>
    %133 = arith.addf %109, %132 : vector<8x32xf32>
    %c0_50 = arith.constant 0 : index
    %c0_51 = arith.constant 0 : index
    %134 = vector.load %arg7[%c0_50, %c0_51] : memref<1x32xf32, #tpu.memory_space<vmem>>, vector<1x32xf32>
    %135 = vector.broadcast %134 : vector<1x32xf32> to vector<8x32xf32>
    %136 = arith.addf %133, %135 : vector<8x32xf32>
    %c0_52 = arith.constant 0 : index
    %c0_53 = arith.constant 0 : index
    %c0_54 = arith.constant 0 : index
    %137 = vector.load %arg8[%c0_52, %c0_53, %c0_54] : memref<1x8x32xf32, #tpu.memory_space<vmem>>, vector<1x8x32xf32>
    %138 = vector.shape_cast %137 : vector<1x8x32xf32> to vector<8x32xf32>
    %139 = vector.shape_cast %136 : vector<8x32xf32> to vector<1x8x32xf32>
    tpu.vector_store %arg8[%c0_52, %c0_53, %c0_54], %139 {strides = array<i32>} : memref<1x8x32xf32, #tpu.memory_space<vmem>>, vector<1x8x32xf32>,
    %cst_55 = arith.constant 2.500000e-01 : f32
    %140 = vector.broadcast %cst_55 : f32 to vector<1x8xf32>
    %141 = arith.mulf %126, %140 : vector<1x8xf32>
    %c0_56 = arith.constant 0 : index
    %c0_57 = arith.constant 0 : index
    %c0_58 = arith.constant 0 : index
    %142 = vector.load %arg9[%c0_56, %c0_57, %c0_58] : memref<1x1x8xf32, #tpu.memory_space<vmem>>, vector<1x1x8xf32>
    %143 = vector.shape_cast %142 : vector<1x1x8xf32> to vector<1x8xf32>
    %144 = vector.shape_cast %141 : vector<1x8xf32> to vector<1x1x8xf32>
    tpu.vector_store %arg9[%c0_56, %c0_57, %c0_58], %144 {strides = array<i32>} : memref<1x1x8xf32, #tpu.memory_space<vmem>>, vector<1x1x8xf32>,
    return
  }
  func.func @transform_0(%arg0: i32) -> (i32, i32, i32) {
    %c0_i32 = arith.constant 0 : i32
    %c0_i32_0 = arith.constant 0 : i32
    %c0_i32_1 = arith.constant 0 : i32
    return %arg0, %c0_i32, %c0_i32_0 : i32, i32, i32
  }
  func.func @transform_1(%arg0: i32) -> (i32, i32) {
    %c0_i32 = arith.constant 0 : i32
    %c0_i32_0 = arith.constant 0 : i32
    %c0_i32_1 = arith.constant 0 : i32
    return %c0_i32, %c0_i32_0 : i32, i32
  }
  func.func @transform_2(%arg0: i32) -> (i32, i32) {
    %c0_i32 = arith.constant 0 : i32
    %c0_i32_0 = arith.constant 0 : i32
    %c0_i32_1 = arith.constant 0 : i32
    return %c0_i32, %c0_i32_0 : i32, i32
  }
  func.func @transform_3(%arg0: i32) -> (i32, i32) {
    %c0_i32 = arith.constant 0 : i32
    %c0_i32_0 = arith.constant 0 : i32
    %c0_i32_1 = arith.constant 0 : i32
    return %c0_i32, %c0_i32_0 : i32, i32
  }
  func.func @transform_4(%arg0: i32) -> (i32, i32) {
    %c0_i32 = arith.constant 0 : i32
    %c0_i32_0 = arith.constant 0 : i32
    %c0_i32_1 = arith.constant 0 : i32
    return %c0_i32, %c0_i32_0 : i32, i32
  }
  func.func @transform_5(%arg0: i32) -> (i32, i32, i32) {
    %c0_i32 = arith.constant 0 : i32
    %c0_i32_0 = arith.constant 0 : i32
    %c0_i32_1 = arith.constant 0 : i32
    %c0_i32_2 = arith.constant 0 : i32
    return %c0_i32, %c0_i32_0, %c0_i32_1 : i32, i32, i32
  }
  func.func @transform_6(%arg0: i32) -> (i32, i32) {
    %c0_i32 = arith.constant 0 : i32
    %c0_i32_0 = arith.constant 0 : i32
    %c0_i32_1 = arith.constant 0 : i32
    return %c0_i32, %c0_i32_0 : i32, i32
  }
  func.func @transform_7(%arg0: i32) -> (i32, i32, i32) {
    %c0_i32 = arith.constant 0 : i32
    %c0_i32_0 = arith.constant 0 : i32
    %c0_i32_1 = arith.constant 0 : i32
    return %arg0, %c0_i32, %c0_i32_0 : i32, i32, i32
  }
  func.func @transform_8(%arg0: i32) -> (i32, i32, i32) {
    %c0_i32 = arith.constant 0 : i32
    %c0_i32_0 = arith.constant 0 : i32
    %c0_i32_1 = arith.constant 0 : i32
    return %arg0, %c0_i32, %c0_i32_0 : i32, i32, i32
  }
}

module attributes {stable_mosaic.version = 11 : i64} {
  func.func @_mlp_kernel(%arg0: i32, %arg1: i32, %arg2: memref<1x4x32xf32, #tpu.memory_space<vmem>>, %arg3: memref<1x32xf32, #tpu.memory_space<vmem>>, %arg4: memref<1x32xf32, #tpu.memory_space<vmem>>, %arg5: memref<32x128xbf16, #tpu.memory_space<vmem>>, %arg6: memref<1x128xf32, #tpu.memory_space<vmem>>, %arg7: memref<128x32xbf16, #tpu.memory_space<vmem>>, %arg8: memref<1x32xf32, #tpu.memory_space<vmem>>, %arg9: memref<1x4x32xf32, #tpu.memory_space<vmem>>, %arg10: memref<4x32xbf16, #tpu.memory_space<vmem>>) attributes {dimension_semantics = [#tpu.dimension_semantics<parallel>, #tpu.dimension_semantics<arbitrary>], iteration_bounds = array<i64: 2, 1>, scalar_prefetch = 0 : i64, scratch_operands = 1 : i64, tpu.core_type = #tpu.core_type<tc>, window_params = [{transform_indices = @transform_0, window_bounds = array<i64: 1, 4, 32>}, {pipeline_mode = #tpu.pipeline_mode<synchronous>, transform_indices = @transform_1, window_bounds = array<i64: 1, 32>}, {pipeline_mode = #tpu.pipeline_mode<synchronous>, transform_indices = @transform_2, window_bounds = array<i64: 1, 32>}, {transform_indices = @transform_3, window_bounds = array<i64: 32, 128>}, {transform_indices = @transform_4, window_bounds = array<i64: 1, 128>}, {transform_indices = @transform_5, window_bounds = array<i64: 128, 32>}, {pipeline_mode = #tpu.pipeline_mode<synchronous>, transform_indices = @transform_6, window_bounds = array<i64: 1, 32>}, {transform_indices = @transform_7, window_bounds = array<i64: 1, 4, 32>}]} {
    %c0_i32 = arith.constant 0 : i32
    %0 = arith.cmpi eq, %arg1, %c0_i32 : i32
    %1 = arith.extui %0 : i1 to i32
    %c0_i32_0 = arith.constant 0 : i32
    %2 = arith.cmpi ne, %1, %c0_i32_0 : i32
    scf.if %2 {
      %c0_30 = arith.constant 0 : index
      %c0_31 = arith.constant 0 : index
      %c0_32 = arith.constant 0 : index
      %58 = vector.load %arg2[%c0_30, %c0_31, %c0_32] : memref<1x4x32xf32, #tpu.memory_space<vmem>>, vector<1x4x32xf32>
      %59 = vector.shape_cast %58 : vector<1x4x32xf32> to vector<4x32xf32>
      %cst_33 = arith.constant dense<0.000000e+00> : vector<4xf32>
      %60 = vector.multi_reduction <add>, %59, %cst_33 [1] : vector<4x32xf32> to vector<4xf32>
      %61 = vector.shape_cast %60 : vector<4xf32> to vector<4x1xf32>
      %cst_34 = arith.constant 3.200000e+01 : f32
      %62 = vector.broadcast %cst_34 : f32 to vector<4x1xf32>
      %63 = arith.divf %61, %62 : vector<4x1xf32>
      %64 = vector.broadcast %63 : vector<4x1xf32> to vector<4x32xf32>
      %65 = arith.subf %59, %64 : vector<4x32xf32>
      %66 = arith.mulf %65, %65 : vector<4x32xf32>
      %cst_35 = arith.constant dense<0.000000e+00> : vector<4xf32>
      %67 = vector.multi_reduction <add>, %66, %cst_35 [1] : vector<4x32xf32> to vector<4xf32>
      %68 = vector.shape_cast %67 : vector<4xf32> to vector<4x1xf32>
      %cst_36 = arith.constant 3.200000e+01 : f32
      %69 = vector.broadcast %cst_36 : f32 to vector<4x1xf32>
      %70 = arith.divf %68, %69 : vector<4x1xf32>
      %cst_37 = arith.constant 9.99999974E-6 : f32
      %71 = vector.broadcast %cst_37 : f32 to vector<4x1xf32>
      %72 = arith.addf %70, %71 : vector<4x1xf32>
      %73 = math.rsqrt %72 : vector<4x1xf32>
      %74 = vector.broadcast %73 : vector<4x1xf32> to vector<4x32xf32>
      %75 = arith.mulf %65, %74 : vector<4x32xf32>
      %c0_38 = arith.constant 0 : index
      %c0_39 = arith.constant 0 : index
      %76 = vector.load %arg3[%c0_38, %c0_39] : memref<1x32xf32, #tpu.memory_space<vmem>>, vector<1x32xf32>
      %77 = vector.broadcast %76 : vector<1x32xf32> to vector<4x32xf32>
      %78 = arith.mulf %75, %77 : vector<4x32xf32>
      %c0_40 = arith.constant 0 : index
      %c0_41 = arith.constant 0 : index
      %79 = vector.load %arg4[%c0_40, %c0_41] : memref<1x32xf32, #tpu.memory_space<vmem>>, vector<1x32xf32>
      %80 = vector.broadcast %79 : vector<1x32xf32> to vector<4x32xf32>
      %81 = arith.addf %78, %80 : vector<4x32xf32>
      %82 = arith.truncf %81 : vector<4x32xf32> to vector<4x32xbf16>
      %c0_42 = arith.constant 0 : index
      %c0_43 = arith.constant 0 : index
      %83 = vector.load %arg10[%c0_42, %c0_43] : memref<4x32xbf16, #tpu.memory_space<vmem>>, vector<4x32xbf16>
      tpu.vector_store %arg10[%c0_42, %c0_43], %82 {strides = array<i32>} : memref<4x32xbf16, #tpu.memory_space<vmem>>, vector<4x32xbf16>,
      %c0_44 = arith.constant 0 : index
      %c0_45 = arith.constant 0 : index
      %84 = vector.load %arg8[%c0_44, %c0_45] : memref<1x32xf32, #tpu.memory_space<vmem>>, vector<1x32xf32>
      %85 = vector.broadcast %84 : vector<1x32xf32> to vector<4x32xf32>
      %86 = arith.addf %59, %85 : vector<4x32xf32>
      %c0_46 = arith.constant 0 : index
      %c0_47 = arith.constant 0 : index
      %c0_48 = arith.constant 0 : index
      %87 = vector.load %arg9[%c0_46, %c0_47, %c0_48] : memref<1x4x32xf32, #tpu.memory_space<vmem>>, vector<1x4x32xf32>
      %88 = vector.shape_cast %87 : vector<1x4x32xf32> to vector<4x32xf32>
      %89 = vector.shape_cast %86 : vector<4x32xf32> to vector<1x4x32xf32>
      tpu.vector_store %arg9[%c0_46, %c0_47, %c0_48], %89 {strides = array<i32>} : memref<1x4x32xf32, #tpu.memory_space<vmem>>, vector<1x4x32xf32>,
    } else {
    }
    %c0 = arith.constant 0 : index
    %c0_1 = arith.constant 0 : index
    %3 = vector.load %arg10[%c0, %c0_1] : memref<4x32xbf16, #tpu.memory_space<vmem>>, vector<4x32xbf16>
    %c0_2 = arith.constant 0 : index
    %c0_3 = arith.constant 0 : index
    %4 = vector.load %arg5[%c0_2, %c0_3] : memref<32x128xbf16, #tpu.memory_space<vmem>>, vector<32x128xbf16>
    %cst = arith.constant dense<0.000000e+00> : vector<4x128xf32>
    %5 = tpu.matmul %3, %4, %cst {dimension_numbers = #tpu.dot_dimension_numbers<[1], [0], [0], [1], [0, 0, 1, 1], [], []>} : vector<4x32xbf16>, vector<32x128xbf16>, vector<4x128xf32> -> vector<4x128xf32>
    %c0_4 = arith.constant 0 : index
    %c0_5 = arith.constant 0 : index
    %6 = vector.load %arg6[%c0_4, %c0_5] : memref<1x128xf32, #tpu.memory_space<vmem>>, vector<1x128xf32>
    %7 = vector.broadcast %6 : vector<1x128xf32> to vector<4x128xf32>
    %8 = arith.addf %5, %7 : vector<4x128xf32>
    %cst_6 = arith.constant 5.000000e-01 : f32
    %9 = vector.broadcast %cst_6 : f32 to vector<4x128xf32>
    %10 = arith.mulf %9, %8 : vector<4x128xf32>
    %cst_7 = arith.constant 0.707106769 : f32
    %11 = vector.broadcast %cst_7 : f32 to vector<4x128xf32>
    %12 = arith.mulf %8, %11 : vector<4x128xf32>
    %cst_8 = arith.constant 0.000000e+00 : f32
    %13 = vector.broadcast %cst_8 : f32 to vector<4x128xf32>
    %14 = arith.cmpf oge, %12, %13 : vector<4x128xf32>
    %cst_9 = arith.constant 1.000000e+00 : f32
    %cst_10 = arith.constant -1.000000e+00 : f32
    %15 = vector.broadcast %cst_9 : f32 to vector<4x128xf32>
    %16 = vector.broadcast %cst_10 : f32 to vector<4x128xf32>
    %17 = arith.select %14, %15, %16 : vector<4x128xi1>, vector<4x128xf32>
    %18 = math.absf %12 : vector<4x128xf32>
    %cst_11 = arith.constant 0.327591091 : f32
    %19 = vector.broadcast %cst_11 : f32 to vector<4x128xf32>
    %20 = arith.mulf %19, %18 : vector<4x128xf32>
    %cst_12 = arith.constant 1.000000e+00 : f32
    %21 = vector.broadcast %cst_12 : f32 to vector<4x128xf32>
    %22 = arith.addf %21, %20 : vector<4x128xf32>
    %23 = tpu.reciprocal %22 : vector<4x128xf32> -> vector<4x128xf32>
    %cst_13 = arith.constant 1.06140542 : f32
    %24 = vector.broadcast %cst_13 : f32 to vector<4x128xf32>
    %25 = arith.mulf %24, %23 : vector<4x128xf32>
    %cst_14 = arith.constant -1.45315206 : f32
    %26 = vector.broadcast %cst_14 : f32 to vector<4x128xf32>
    %27 = arith.addf %25, %26 : vector<4x128xf32>
    %28 = arith.mulf %27, %23 : vector<4x128xf32>
    %cst_15 = arith.constant 1.42141378 : f32
    %29 = vector.broadcast %cst_15 : f32 to vector<4x128xf32>
    %30 = arith.addf %28, %29 : vector<4x128xf32>
    %31 = arith.mulf %30, %23 : vector<4x128xf32>
    %cst_16 = arith.constant -0.284496725 : f32
    %32 = vector.broadcast %cst_16 : f32 to vector<4x128xf32>
    %33 = arith.addf %31, %32 : vector<4x128xf32>
    %34 = arith.mulf %33, %23 : vector<4x128xf32>
    %cst_17 = arith.constant 0.254829586 : f32
    %35 = vector.broadcast %cst_17 : f32 to vector<4x128xf32>
    %36 = arith.addf %34, %35 : vector<4x128xf32>
    %37 = arith.mulf %36, %23 : vector<4x128xf32>
    %cst_18 = arith.constant 0.000000e+00 : f32
    %38 = vector.broadcast %cst_18 : f32 to vector<4x128xf32>
    %39 = arith.subf %38, %18 : vector<4x128xf32>
    %40 = arith.mulf %39, %18 : vector<4x128xf32>
    %41 = math.exp %40 : vector<4x128xf32>
    %42 = arith.mulf %37, %41 : vector<4x128xf32>
    %cst_19 = arith.constant 1.000000e+00 : f32
    %43 = vector.broadcast %cst_19 : f32 to vector<4x128xf32>
    %44 = arith.subf %43, %42 : vector<4x128xf32>
    %45 = arith.mulf %17, %44 : vector<4x128xf32>
    %cst_20 = arith.constant 1.000000e+00 : f32
    %46 = vector.broadcast %cst_20 : f32 to vector<4x128xf32>
    %47 = arith.addf %46, %45 : vector<4x128xf32>
    %48 = arith.mulf %10, %47 : vector<4x128xf32>
    %c0_21 = arith.constant 0 : index
    %c0_22 = arith.constant 0 : index
    %c0_23 = arith.constant 0 : index
    %49 = vector.load %arg9[%c0_21, %c0_22, %c0_23] : memref<1x4x32xf32, #tpu.memory_space<vmem>>, vector<1x4x32xf32>
    %50 = vector.shape_cast %49 : vector<1x4x32xf32> to vector<4x32xf32>
    %51 = arith.truncf %48 : vector<4x128xf32> to vector<4x128xbf16>
    %c0_24 = arith.constant 0 : index
    %c0_25 = arith.constant 0 : index
    %52 = vector.load %arg7[%c0_24, %c0_25] : memref<128x32xbf16, #tpu.memory_space<vmem>>, vector<128x32xbf16>
    %cst_26 = arith.constant dense<0.000000e+00> : vector<4x32xf32>
    %53 = tpu.matmul %51, %52, %cst_26 {dimension_numbers = #tpu.dot_dimension_numbers<[1], [0], [0], [1], [0, 0, 1, 1], [], []>} : vector<4x128xbf16>, vector<128x32xbf16>, vector<4x32xf32> -> vector<4x32xf32>
    %54 = arith.addf %50, %53 : vector<4x32xf32>
    %c0_27 = arith.constant 0 : index
    %c0_28 = arith.constant 0 : index
    %c0_29 = arith.constant 0 : index
    %55 = vector.load %arg9[%c0_27, %c0_28, %c0_29] : memref<1x4x32xf32, #tpu.memory_space<vmem>>, vector<1x4x32xf32>
    %56 = vector.shape_cast %55 : vector<1x4x32xf32> to vector<4x32xf32>
    %57 = vector.shape_cast %54 : vector<4x32xf32> to vector<1x4x32xf32>
    tpu.vector_store %arg9[%c0_27, %c0_28, %c0_29], %57 {strides = array<i32>} : memref<1x4x32xf32, #tpu.memory_space<vmem>>, vector<1x4x32xf32>,
    return
  }
  func.func @transform_0(%arg0: i32, %arg1: i32) -> (i32, i32, i32) {
    %c0_i32 = arith.constant 0 : i32
    %c0_i32_0 = arith.constant 0 : i32
    %c0_i32_1 = arith.constant 0 : i32
    return %arg0, %c0_i32, %c0_i32_0 : i32, i32, i32
  }
  func.func @transform_1(%arg0: i32, %arg1: i32) -> (i32, i32) {
    %c0_i32 = arith.constant 0 : i32
    %c0_i32_0 = arith.constant 0 : i32
    %c0_i32_1 = arith.constant 0 : i32
    return %c0_i32, %c0_i32_0 : i32, i32
  }
  func.func @transform_2(%arg0: i32, %arg1: i32) -> (i32, i32) {
    %c0_i32 = arith.constant 0 : i32
    %c0_i32_0 = arith.constant 0 : i32
    %c0_i32_1 = arith.constant 0 : i32
    return %c0_i32, %c0_i32_0 : i32, i32
  }
  func.func @transform_3(%arg0: i32, %arg1: i32) -> (i32, i32) {
    %c0_i32 = arith.constant 0 : i32
    %c0_i32_0 = arith.constant 0 : i32
    return %c0_i32, %arg1 : i32, i32
  }
  func.func @transform_4(%arg0: i32, %arg1: i32) -> (i32, i32) {
    %c0_i32 = arith.constant 0 : i32
    %c0_i32_0 = arith.constant 0 : i32
    return %c0_i32, %arg1 : i32, i32
  }
  func.func @transform_5(%arg0: i32, %arg1: i32) -> (i32, i32) {
    %c0_i32 = arith.constant 0 : i32
    %c0_i32_0 = arith.constant 0 : i32
    return %arg1, %c0_i32 : i32, i32
  }
  func.func @transform_6(%arg0: i32, %arg1: i32) -> (i32, i32) {
    %c0_i32 = arith.constant 0 : i32
    %c0_i32_0 = arith.constant 0 : i32
    %c0_i32_1 = arith.constant 0 : i32
    return %c0_i32, %c0_i32_0 : i32, i32
  }
  func.func @transform_7(%arg0: i32, %arg1: i32) -> (i32, i32, i32) {
    %c0_i32 = arith.constant 0 : i32
    %c0_i32_0 = arith.constant 0 : i32
    %c0_i32_1 = arith.constant 0 : i32
    return %arg0, %c0_i32, %c0_i32_0 : i32, i32, i32
  }
}

</mosaic_0001>

<bundles_post_ra>
// kernel: block_forward.3
= control target key start
LH: loop header
LB: loop body
LE: loop exit
PB: predicated region body
PF: predicated region fallthrough
CT: control target
= control target key end

     0   :  { %12 = vsyncpa [#allocation4], 0  ;;  %s1146_s0 = inlined_call_operand.vmem [shape: f32[2,4,32], index: 0, kind: input, shape index: {}]   ;;  %s1147_s1 = inlined_call_operand.vmem [shape: f32[1,32], index: 1, kind: input, shape index: {}]   ;;  %s1148_s2 = inlined_call_operand.vmem [shape: f32[1,32], index: 2, kind: input, shape index: {}]   ;;  %s1149_s3 = inlined_call_operand.vmem [shape: bf16[32,128], index: 3, kind: input, shape index: {}]   ;;  %s1150_s4 = inlined_call_operand.vmem [shape: f32[1,128], index: 4, kind: input, shape index: {}]   ;;  %s1151_s5 = inlined_call_operand.vmem [shape: bf16[128,32], index: 5, kind: input, shape index: {}]   ;;  %s1152_s6 = inlined_call_operand.vmem [shape: f32[1,32], index: 6, kind: input, shape index: {}]   ;;  %s1153_s7 = inlined_call_operand.hbm [shape: f32[2,4,32], index: 7, kind: output, shape index: {}]  }
   0x1   :  { %14 = vsyncpa [#allocation4 + $0x1], 0  ;;  %s979_s24 = smov 0   ;;  %s981_s25 = smov 0  }
   0x2   :  { %s983_s26 = smov 0   ;;  %s985_s27 = smov 0  }
   0x3   :  { %s987_s28 = smov 0   ;;  %s989_s29 = smov 0  }
   0x4 LB: > { %s714_s30 = sadd.s32 4294967295, %s933_s29   ;;  %s715_s8 = sadd.s32 4294967294, %s933_s29   ;;  %s933_s29 = sphi %s989_s29, %s20_s29   ;;  %s929_s28 = sphi %s987_s28, %s1160_s28   ;;  %s925_s27 = sphi %s985_s27, %s1159_s27   ;;  %s921_s26 = sphi %s983_s26, %s1158_s26   ;;  %s917_s25 = sphi %s981_s25, %s1157_s25   ;;  %s913_s24 = sphi %s979_s24, %s1156_s24  }
   0x5   : > { %s32_s9 = sadd.s32 1, %s929_s28  ;;  %s206_s10 = sadd.s32 1, %s921_s26 }
   0x6   : > { %p34_p0 = scmp.ge.s32.totalorder %s32_s9, 2  ;;  %p216_p1 = scmp.ne.s32.totalorder %s921_s26, %s917_s25 }
   0x7   : > { %p217_p2 = scmp.eq.s32.totalorder %s714_s30, 1  ;;  %p222_p3 = scmp.ne.s32.totalorder %s917_s25, %s913_s24 }
   0x8   : > { %s1162_s9 = smov (%p34_p0, %s32_s9), 0  ;;  %p223_p5 = scmp.eq.s32.totalorder %s715_s8, 1 }
   0x9   : > { %p1019_p4 = por %p217_p2, %p216_p1  ;;  %s203_s12 = ssub.s32 %s929_s28, %s1162_s9 }
   0xa   : > { %p721_p6 = scmp.ge.s32.totalorder %s933_s29, 1  ;;  %p204_p7 = scmp.eq.s32.totalorder %s203_s12, 0 }
   0xb   : > { %p1026_p8 = por %p223_p5, %p222_p3  ;;  %p279_p9 = scmp.lt.s32.totalorder %s933_s29, 3 }
   0xc   : > { %s1032_s14 = scalar_select %p204_p7, %s921_s26, %s206_s10  }
   0xd   : > { %p280_p10 = pnand %p721_p6, %p279_p9 }
   0xe   : > { %p322_p11 = scmp.lt.s32.totalorder (!%p280_p10), %s925_s27, 1  ;;  %s319_s20 = sand.u32 (!%p280_p10), 1, %s917_s25  }
   0xf   : > { %283 = sbr.rel (%p280_p10) target bundleno = 799 (0x31f), region = 48  ;;  %s722_s21 = sshll.u32 (!%p280_p10), %s319_s20, 2 }
  0x10   : > { %s1083_s22 = scalar_lea.vmem (!%p280_p10), [#allocation3], %s722_s21  ;;  %s740_s8 = sshll.u32 (!%p280_p10), %s925_s27, 6 }
  0x11   : > { %s605_s10 = sshll.u32 (!%p280_p10), %s1083_s22, 4  ;;  %s592_s17 = scalar_lea.sflag (!%p280_p10), [#allocation4], %s319_s20  ;;  %s1098_s10 = int_to_ptr.vmem [resolvable:$true] %s605_s10 }
  0x12   : > { %s938_s18 = smov (!%p280_p10), [#allocation3]  }
  0x14   : > { %s323_s15 = scalar_select %p322_p11, %s925_s27, 1  ;;  %vm345_vm0 = vcmask 257024   ;;  %v841_v7 = vld [vmem:[%s1149_s3 + $0x8] sm:$0xff]   ;;  %v935_v8 = vmov 0.0   ;;  %v842_v9 = vld [vmem:[%s1149_s3] sm:$0xff]   ;;  %vm936_vm1 = vmmov 0  }
  0x15   : > { %755 = vmatprep.subr.bf16.mxu0 %v935_v8  ;;  %763 = vmatprep.subr.bf16.mxu1 %v935_v8  ;;  %v724_v14 = vld [vmem:[%s1147_s1] ss:$0 sm:$0xff]  ;;  %vm377_vm2 = vcmask 254976   ;;  %vm412_vm3 = vcmask 261120   ;;  %v843_v21 = vld [vmem:[%s1151_s5 + $0x38] sm:$0xff]   ;;  %v844_v22 = vld [vmem:[%s1151_s5 + $0x30] sm:$0xff]  }
  0x16   : > { %s723_s16 = sshll.u32 %s323_s15, 2  ;;  %756 = vmatpush3.bf16.msra.mxu0 %v841_v7  ;;  %759 = vmatprep.mubr.msk.bf16.mxu0 %vm936_vm1, %v935_v8  ;;  %v725_v16 = vld [vmem:[%s1148_s2] ss:$0 sm:$0xff]  ;;  %v845_v23 = vld [vmem:[%s1151_s5 + $0x28] sm:$0xff]   ;;  %v847_v25 = vld [vmem:[%s1151_s5 + $0x18] sm:$0xff]   ;;  %v937_v57 = vmov -1.0  }
  0x17   : > { %s325_s19 = scalar_lea.vmem %s1146_s0, %s723_s16  ;;  %757 = vmatprep.subr.bf16.mxu0 %v935_v8  ;;  %779 = vmatprep.mubr.msk.bf16.mxu1 %vm936_vm1, %v935_v8  ;;  %v846_v24 = vld [vmem:[%s1151_s5 + $0x20] sm:$0xff]   ;;  %v848_v26 = vld [vmem:[%s1151_s5 + $0x10] sm:$0xff]   ;;  %v849_v27 = vld [vmem:[%s1151_s5 + $0x8] sm:$0xff]   ;;  %s1096_s16 = scalar_lea.hbm %s1153_s7, %s740_s8 }
  0x18   : > { %v344_v0 = vld [vmem:[%s325_s19] sm:$0xf]  ;;  %764 = vmatpush3.bf16.msra.mxu1 %v843_v21  ;;  %s857_s27 = scalar_lea.vmem %s1098_s10, 64  ;;  %s861_s19 = sshll.u32 %s938_s18, 4  ;;  %s862_s19 = int_to_ptr.vmem [resolvable:$false] %s861_s19 }
  0x19   : > { %v346_v1 = vsel %vm345_vm0, %v344_v0, 0.0  ;;  %765 = vmatprep.subr.bf16.mxu1 %v935_v8  ;;  %v850_v28 = vld [vmem:[%s1151_s5] sm:$0xff]   ;;  %p858_p12 = scmp.ne.s32.totalorder %s1098_s10, %s857_s27  ;;  %s863_s21 = scalar_lea.vmem %s862_s19, 128 }
  0x1a   : > { %347 = vadd.xlane.f32.xlu0 %v346_v1  ;;  %758 = vmatpush3.bf16.msra.mxu0 %v842_v9  ;;  %v726_v29 = vld [vmem:[%s1152_s6] ss:$0 sm:$0xff]  ;;  %p864_p1 = scmp.lt.s32.totalorder %s1098_s10, %s862_s19  ;;  %p865_p2 = scmp.lt.s32.totalorder %s863_s21, %s857_s27 }
  0x1b   : > { %v386_v30 = vadd.f32 %v726_v29, %v344_v0  ;;  %v727_v31 = vld [vmem:[%s1150_s4] ss:$0 sm:$0xff]  ;;  %p859_p13 = pnand %p858_p12, %p1019_p4 }
  0x1c   : > { %766 = vmatpush3.bf16.msra.mxu1 %v844_v22  ;;  %p866_p3 = por %p865_p2, %p864_p1 }
  0x1d   : > { %767 = vmatprep.subr.bf16.mxu1 %v935_v8  ;;  %387 = vst.msk [vmem:[%s1083_s22] sm:$0xf] %vm345_vm0, %v386_v30  ;;  %p860_p0 = pneg %p859_p13 }
  0x1f   : > { %p867_p5 = pnand %p866_p3, %p860_p0 }
  0x20   : > { %768 = vmatpush3.bf16.msra.mxu1 %v845_v23 }
  0x21   : > { %769 = vmatprep.subr.bf16.mxu1 %v935_v8 }
  0x24   : > { %770 = vmatpush3.bf16.msra.mxu1 %v846_v24 }
  0x25   : > { %771 = vmatprep.subr.bf16.mxu1 %v935_v8 }
  0x28   : > { %772 = vmatpush3.bf16.msra.mxu1 %v847_v25 }
  0x29   : > { %773 = vmatprep.subr.bf16.mxu1 %v935_v8 }
  0x2c   : > { %774 = vmatpush3.bf16.msra.mxu1 %v848_v26 }
  0x2d   : > { %775 = vmatprep.subr.bf16.mxu1 %v935_v8 }
  0x30   : > { %776 = vmatpush3.bf16.msra.mxu1 %v849_v27 }
  0x31   : > { %777 = vmatprep.subr.bf16.mxu1 %v935_v8 }
  0x34   : > { %778 = vmatpush3.bf16.msra.mxu1 %v850_v28 }
  0xa3   : > { %v348_v2 = vpop.xlane.xlu0 %347 }
  0xa4   : > { %v350_v3 = vmul.f32 0.03125, %v348_v2 }
  0xa6   : > { %v351_v4 = vsub.f32 %v344_v0, %v350_v3  ;;  %v482_v0 = vld [vmem:[%s1083_s22] sm:$0xf] }
  0xa8   : > { %v352_v5 = vmul.f32 %v351_v4, %v351_v4 }
  0xaa   : > { %v353_v6 = vsel %vm345_vm0, %v352_v5, 0.0 }
  0xab   : > { %354 = vadd.xlane.f32.xlu0 %v353_v6 }
 0x134   : > { %v355_v10 = vpop.xlane.xlu0 %354 }
 0x135   : > { %v356_v11 = vmul.f32 0.03125, %v355_v10 }
 0x137   : > { %v357_v12 = vadd.f32 1e-05, %v356_v11 }
 0x139   : > { %851 = vrsqrt.f32 %v357_v12 }
 0x146   : > { %v852_v13 = vpop.eup %851 }
 0x147   : > { %v359_v15 = vmul.f32 %v852_v13, %v351_v4 }
 0x149   : > { %v367_v17 = vmul.f32 %v724_v14, %v359_v15 }
 0x14b   : > { %v375_v18 = vadd.f32 %v725_v16, %v367_v17 }
 0x14d   : > { %v376_v19 = vpack.c.bf16 %v375_v18, %v375_v18 }
 0x14f   : > { %378 = vst.msk [vmem:[#allocation2] sm:$0x3] %vm377_vm2, %v376_v19 }
 0x156   : > { %v388_v20 = vld [vmem:[#allocation2] sm:$0x3] }
 0x157   : > { %760 = vmatmul.mubr.msk.bf16.vlgmr.msra.gmra.mxu0 %vm412_vm3, %v388_v20 }
 0x217   : > { %v450_v32 = vpop.f32.mrf.mxu0 }
 0x218   : > { %v451_v33 = vadd.f32 %v727_v31, %v450_v32 }
 0x219   : > { %v761_v34 = vpop.f32.mrf.mxu0 }
 0x21a   : > { %v457_v35 = vmul.f32 0.70710677, %v451_v33  ;;  %v456_v60 = vmul.f32 0.5, %v451_v33 }
 0x21b   : > { %v453_v36 = vpop.f32.mrf.mxu0 }
 0x21c   : > { %v460_v37 = vand.u32 2147483647, %v457_v35  ;;  %vm458_vm4 = vcmp.ge.f32.partialorder %v457_v35, 0.0 }
 0x21d   : > { %v762_v38 = vpop.f32.mrf.mxu0  ;;  %v459_v58 = vsel %vm458_vm4, 1.0, %v937_v57 }
 0x21e   : > { %v461_v39 = vmul.f32 0.3275911, %v460_v37  ;;  %v473_v41 = vsub.f32 0.0, %v460_v37 }
 0x220   : > { %v462_v40 = vadd.f32 1.0, %v461_v39  ;;  %v474_v42 = vmul.f32 %v473_v41, %v460_v37 }
 0x222   : > { %853 = vrcp.f32 %v462_v40  ;;  %v475_v45 = vmul.f32 1.442695, %v474_v42 }
 0x224   : > { %855 = vpow2.f32 %v475_v45 }
 0x22f   : > { %v854_v43 = vpop.eup %853 }
 0x230   : > { %v464_v44 = vmul.f32 1.0614054, %v854_v43 }
 0x231   : > { %v856_v54 = vpop.eup %855 }
 0x232   : > { %v465_v46 = vadd.f32 -1.4531521, %v464_v44 }
 0x234   : > { %v466_v47 = vmul.f32 %v854_v43, %v465_v46 }
 0x236   : > { %v467_v48 = vadd.f32 1.4214138, %v466_v47 }
 0x238   : > { %v468_v49 = vmul.f32 %v854_v43, %v467_v48 }
 0x23a   : > { %v469_v50 = vadd.f32 -0.28449672, %v468_v49 }
 0x23c   : > { %v470_v51 = vmul.f32 %v854_v43, %v469_v50 }
 0x23e   : > { %v471_v52 = vadd.f32 0.2548296, %v470_v51 }
 0x240   : > { %v472_v53 = vmul.f32 %v854_v43, %v471_v52 }
 0x242   : > { %v477_v55 = vmul.f32 %v856_v54, %v472_v53 }
 0x244   : > { %v478_v56 = vsub.f32 1.0, %v477_v55 }
 0x246   : > { %v479_v59 = vmul.f32 %v478_v56, %v459_v58 }
 0x248   : > { %v480_v61 = vadd.f32 1.0, %v479_v59 }
 0x24a   : > { %v481_v62 = vmul.f32 %v480_v61, %v456_v60 }
 0x24c   : > { %v483_v63 = vpack.c.bf16 %v481_v62, %v481_v62 }
 0x24e   : > { %780 = vmatmul.mubr.bf16.vlgmr.msra.gmra.mxu1 %v483_v63 }
 0x30e   : > { %v582_v1 = vpop.f32.mrf.mxu1 }
 0x30f   : > { %v588_v2 = vadd.f32 %v582_v1, %v482_v0 }
 0x310   : > { %v781_v3 = vpop.f32.mrf.mxu1 }
 0x311   : > { %590 = vst.msk [vmem:[%s1083_s22] sm:$0xf] %vm345_vm0, %v588_v2 }
 0x312   : > { %v585_v4 = vpop.f32.mrf.mxu1 }
 0x313   : > { %870 = shalt.err (!%p867_p5)
}
 0x314   : > { %s871_s22 = scalar_lea.hbm %s1096_s16, 64  ;;  %s875_s30 = scalar_lea.hbm %s1153_s7, 128 }
 0x315   : > { %p872_p6 = scmp.ne.s32.totalorder %s1096_s16, %s871_s22  ;;  %p876_p10 = scmp.lt.s32.totalorder %s1096_s16, %s1153_s7 }
 0x316   : > { %p877_p11 = scmp.lt.s32.totalorder %s875_s30, %s871_s22 }
 0x317   : > { %p873_p7 = pnand %p872_p6, %p1019_p4 }
 0x318   : > { %p878_p12 = por %p877_p11, %p876_p10 }
 0x319   : > { %p874_p9 = pneg %p873_p7 }
 0x31b   : > { %p879_p13 = pnand %p878_p12, %p874_p9 }
 0x31d   : > { %882 = shalt.err (!%p879_p13)
}
 0x31e   : > { %783 = dma.vmem_to_hbm [thread:$0]  (%p1019_p4), %s1098_s10, 64, %s1096_s16, %s592_s17   ;;  %v782_v5 = vpop.f32.mrf.mxu1 }
 0x31f PF: > { %p789_p0 = scmp.ge.s32.totalorder %s933_s29, 2  ;;  %s617_s15 = sand.u32 1, %s913_s24  }
 0x320   : > { %s618_s27 = scalar_lea.sflag [#allocation4], %s617_s15 }
 0x321   : > { %p786_p1 = pnand %p789_p0, %p1026_p8 }
 0x323   : > { %p787_p2 = pneg %p786_p1 }
 0x325   : > { %908 = dma.done.wait (%p787_p2), %s618_s27, 64  }
 0x326   : > { %910 = vsyncadd (%p787_p2), %s618_s27, 4294967232  ;;  %s20_s29 = sadd.s32 1, %s933_s29   ;;  %s1156_s24 = smov %s917_s25 }
 0x327   : > { %p17_p3 = scmp.ge.s32.totalorder %s20_s29, 4   ;;  %s1157_s25 = smov %s921_s26 }
 0x328   : > { %s1158_s26 = smov %s1032_s14  ;;  %s1159_s27 = smov %s929_s28 }
 0x329   : > { %s1160_s28 = smov %s1162_s9  ;;  %19 = sbr.rel (!%p17_p3) target bundleno = 4 (0x4), region = 96 }
 0x32e   :  { %623 = vsyncpa [#allocation4], 1 }
 0x32f   :  { %625 = vsyncpa [#allocation4 + $0x1], 1 }

// kernel: block_forward.2
= control target key start
LH: loop header
LB: loop body
LE: loop exit
PB: predicated region body
PF: predicated region fallthrough
CT: control target
= control target key end

     0   :  { %14 = vsyncpa [#allocation3], 0  ;;  %s1741_s0 = inlined_call_operand.vmem [shape: f32[2,8,32], index: 0, kind: input, shape index: {}]   ;;  %s1742_s1 = inlined_call_operand.vmem [shape: f32[1,32], index: 1, kind: input, shape index: {}]   ;;  %s1743_s2 = inlined_call_operand.vmem [shape: f32[1,32], index: 2, kind: input, shape index: {}]   ;;  %s1744_s3 = inlined_call_operand.hbm [shape: bf16[32,96], index: 3, kind: input, shape index: {}]   ;;  %s1745_s4 = inlined_call_operand.vmem [shape: f32[1,96], index: 4, kind: input, shape index: {}]   ;;  %s1746_s5 = inlined_call_operand.hbm [shape: bf16[4,8,32], index: 5, kind: input, shape index: {}]   ;;  %s1747_s6 = inlined_call_operand.vmem [shape: f32[1,32], index: 6, kind: input, shape index: {}]   ;;  %s1748_s7 = inlined_call_operand.vmem [shape: f32[2,8,32], index: 7, kind: output, shape index: {0}]   ;;  %s1749_s8 = inlined_call_operand.vmem [shape: f32[2,1,8], index: 8, kind: output, shape index: {1}]  }
   0x1   :  { %15 = vsyncpa [#allocation5], 0  ;;  %s1556_s27 = smov 0  }
   0x2 LB: > { %s1562_s28 = sadd.s32 4294967295, %s1492_s27   ;;  %p1225_p0 = scmp.ge.s32.totalorder %s1492_s27, 1  ;;  %s1492_s27 = sphi %s1556_s27, %s21_s27  }
   0x3   : > { %p230_p1 = scmp.lt.s32.totalorder %s1492_s27, 3  ;;  %s1494_s29 = smov [#allocation2]  }
   0x4   : > { %s248_s30 = sshll.u32 %s1494_s29, 4  ;;  %p1377_p3 = scmp.eq.s32.totalorder %s1562_s28, 0  ;;  %s249_s30 = int_to_ptr.vmem [resolvable:$true] %s248_s30 }
   0x5   : > { %p1566_p2 = pnand %p1225_p0, %p230_p1  ;;  %s1495_s10 = smov [#allocation4]  }
   0x6   : > { %s264_s11 = sshll.u32 %s1495_s10, 4  ;;  %s1437_s13 = scalar_lea.vmem %s249_s30, 256  ;;  %s265_s11 = int_to_ptr.vmem [resolvable:$true] %s264_s11 }
   0x7   : > { %p1370_p4 = pneg %p1566_p2  ;;  %p1438_p7 = scmp.ne.s32.totalorder %s249_s30, %s1437_s13 }
   0x8   : > { %p1445_p10 = scmp.lt.s32.totalorder %s249_s30, %s249_s30  ;;  %p1446_p11 = scmp.lt.s32.totalorder %s1437_s13, %s1437_s13 }
   0x9   : > { %p1575_p5 = pnand %p1377_p3, %p1370_p4 }
   0xa   : > { %p1447_p12 = por %p1446_p11, %p1445_p10 }
   0xb   : > { %p1428_p6 = pneg %p1575_p5 }
   0xd   : > { %p1440_p8 = pnand %p1438_p7, %p1428_p6 }
   0xf   : > { %p1441_p9 = pneg %p1440_p8 }
  0x11   : > { %p1448_p13 = pnand %p1447_p12, %p1441_p9 }
  0x13   : > { %1451 = shalt.err (!%p1448_p13)
}
  0x14   : > { %s1496_s14 = smov 64   ;;  %s1497_s15 = smov 4  }
  0x15   : > { %1373 = dma.hbm_to_vmem [thread:$0]  (!%p1575_p5), %s1744_s3, 256, %s249_s30, [#allocation3], %s1496_s14, %s1496_s14, %s1497_s15  }
  0x16   : > { %s1463_s18 = scalar_lea.vmem %s265_s11, 256  ;;  %p1471_p7 = scmp.lt.s32.totalorder %s265_s11, %s265_s11 }
  0x17   : > { %p1464_p0 = scmp.ne.s32.totalorder %s265_s11, %s1463_s18  ;;  %p1472_p8 = scmp.lt.s32.totalorder %s1463_s18, %s1463_s18 }
  0x19   : > { %p1466_p1 = pnand %p1464_p0, %p1428_p6  ;;  %p1473_p10 = por %p1472_p8, %p1471_p7 }
  0x1b   : > { %p1467_p4 = pneg %p1466_p1 }
  0x1d   : > { %p1474_p9 = pnand %p1473_p10, %p1467_p4 }
  0x1f   : > { %1477 = shalt.err (!%p1474_p9)
}
  0x20   : > { %1376 = dma.hbm_to_vmem [thread:$0]  (!%p1575_p5), %s1746_s5, 256, %s265_s11, [#allocation5], %s1496_s14, %s1496_s14, %s1497_s15  }
  0x21   : > { %290 = sbr.rel (%p1566_p2) target bundleno = 2811 (0xafb), region = 48 }
  0x26   : > { %1483 = dma.done.wait (%p1377_p3), [#allocation3], 256  }
  0x27   : > { %1485 = vsyncadd (%p1377_p3), [#allocation3], 4294967040 }
  0x28   : > { %1487 = dma.done.wait (%p1377_p3), [#allocation5], 256  }
  0x29   : > { %1489 = vsyncadd (%p1377_p3), [#allocation5], 4294967040  ;;  %p329_p6 = scmp.lt.s32.totalorder %s1562_s28, 1  ;;  %vm342_vm0 = vcmask 261120   ;;  %v1406_v7 = vld [vmem:[#allocation2 + $0x8] sm:$0xff]   ;;  %v1498_v8 = vmov 0.0  }
  0x2a   : > { %1282 = vmatprep.subr.bf16.mxu0 %v1498_v8  ;;  %vm1499_vm1 = vmmov 0   ;;  %v1407_v9 = vld [vmem:[#allocation2] sm:$0xff]   ;;  %1290 = vmatprep.subr.bf16.mxu1 %v1498_v8  ;;  %s1500_s11 = smov 120   ;;  %s1501_s12 = smov 96   ;;  %vm444_vm2 = vcmask 64512   ;;  %vm516_vm3 = vcmask 1043456  }
  0x2b   : > { %s1753_s28 = smov (!%p329_p6, %s1562_s28), 1  ;;  %1286 = vmatprep.mubr.msk.bf16.mxu0 %vm1499_vm1, %v1498_v8  ;;  %1283 = vmatpush3.bf16.msra.mxu0 %v1406_v7  ;;  %v1234_v14 = vld [vmem:[%s1742_s1] ss:$0 sm:$0xff]  ;;  %s1502_s13 = smov 88   ;;  %vm1121_vm4 = vcmask 57344  }
  0x2c   : > { %s1232_s21 = sshll.u32 %s1753_s28, 3  ;;  %1284 = vmatprep.subr.bf16.mxu0 %v1498_v8  ;;  %1292 = vmatprep.mubr.msk.bf16.mxu1 %vm1499_vm1, %v1498_v8  ;;  %v1235_v16 = vld [vmem:[%s1743_s2] ss:$0 sm:$0xff]  ;;  %s1503_s14 = smov 56  }
  0x2d   : > { %s332_s24 = scalar_lea.vmem %s1741_s0, %s1232_s21  ;;  %v1236_v20 = vld [vmem:[%s1745_s4] ss:$0 sm:$0xff]  ;;  %s1504_s15 = smov 64  }
  0x2e   : > { %v341_v0 = vld [vmem:[%s332_s24] sm:$0xff]  ;;  %s1505_s16 = smov 80   ;;  %s1506_s17 = smov 112  }
  0x2f   : > { %v343_v1 = vsel %vm342_vm0, %v341_v0, 0.0  ;;  %1285 = vmatpush3.bf16.msra.mxu0 %v1407_v9  ;;  %s1507_s18 = smov 48   ;;  %s1508_s19 = smov 104  }
  0x30   : > { %344 = vadd.xlane.f32.xlu0 %v343_v1  ;;  %1296 = vmatprep.subr.bf16.mxu0 %v1498_v8  ;;  %s1509_s20 = smov 72   ;;  %s1510_s22 = smov 40  }
  0x31   : > { %s339_s25 = scalar_lea.vmem %s1749_s8, %s1753_s28  ;;  %s336_s10 = scalar_lea.vmem %s1748_s7, %s1232_s21 }
  0xb9   : > { %v345_v2 = vpop.xlane.xlu0 %344 }
  0xba   : > { %v347_v3 = vmul.f32 0.03125, %v345_v2 }
  0xbc   : > { %v348_v4 = vsub.f32 %v341_v0, %v347_v3 }
  0xbe   : > { %v349_v5 = vmul.f32 %v348_v4, %v348_v4 }
  0xc0   : > { %v350_v6 = vsel %vm342_vm0, %v349_v5, 0.0 }
  0xc1   : > { %351 = vadd.xlane.f32.xlu0 %v350_v6 }
 0x14a   : > { %v352_v10 = vpop.xlane.xlu0 %351 }
 0x14b   : > { %v353_v11 = vmul.f32 0.03125, %v352_v10 }
 0x14d   : > { %v354_v12 = vadd.f32 1e-06, %v353_v11 }
 0x14f   : > { %1408 = vrsqrt.f32 %v354_v12 }
 0x15c   : > { %v1409_v13 = vpop.eup %1408 }
 0x15d   : > { %v356_v15 = vmul.f32 %v1409_v13, %v348_v4 }
 0x15f   : > { %v364_v17 = vmul.f32 %v1234_v14, %v356_v15 }
 0x161   : > { %v372_v18 = vadd.f32 %v1235_v16, %v364_v17  ;;  %v561_v16 = vld [vmem:[#allocation4] sm:$0xf] }
 0x162   : > { %v733_v17 = vsel %vm516_vm3, %v561_v16, 0 }
 0x163   : > { %v373_v19 = vpack.c.bf16 %v372_v18, %v372_v18  ;;  %v682_v18 = vld [vmem:[#allocation4 + $0x4] sm:$0xf] }
 0x165   : > { %1287 = vmatmul.mubr.msk.bf16.vlgmr.msra.gmra.mxu0 %vm342_vm0, %v373_v19  ;;  %v687_v19 = vsel %vm516_vm3, %v682_v18, 0 }
 0x166   : > { %1298 = vmatprep.mubr.msk.bf16.mxu0 %vm1499_vm1, %v1498_v8 }
 0x225   : > { %v434_v21 = vpop.f32.mrf.mxu0 }
 0x226   : > { %v435_v22 = vadd.f32 %v1236_v20, %v434_v21 }
 0x227   : > { %v1288_v23 = vpop.f32.mrf.mxu0 }
 0x228   : > { %v1639_v24 = vpack.c.bf16 %v435_v22, %v435_v22 }
 0x229   : > { %v437_v25 = vpop.f32.mrf.mxu0 }
 0x22a   : > { %562 = vrot.lane.b32.xlu0 %v1639_v24, %s1500_s11  ;;  %442 = vrot.lane.b32.xlu1 %v1639_v24, %s1501_s12 }
 0x22b   : > { %v1289_v26 = vpop.f32.mrf.mxu0 }
 0x22e   : > { %564 = vrot.lane.b32.xlu1 %v1639_v24, %s1502_s13 }
 0x29c   : > { %v443_v27 = vpop.permute.xlu1 %442  ;;  %v563_v31 = vpop.permute.xlu0 %562 }
 0x29d   : > { %v449_v28 = vsel %vm444_vm2, %v443_v27, 0 }
 0x29e   : > { %1291 = vmatpush3.bf16.xpose.msra.mxu1 %v449_v28 }
 0x29f   : > { %1302 = vmatprep.subr.bf16.mxu1 %v1498_v8 }
 0x2a0   : > { %v565_v29 = vpop.permute.xlu1 %564 }
 0x2a1   : > { %v570_v30 = vsel %vm444_vm2, %v565_v29, 0 }
 0x2a5   : > { %1293 = vmatmul.mubr.msk.bf16.vlgmr.msra.gmra.mxu1 %vm444_vm2, %v1639_v24 }
 0x2a6   : > { %1303 = vmatpush3.bf16.xpose.msra.mxu1 %v570_v30  ;;  %1304 = vmatprep.mubr.msk.bf16.mxu1 %vm1499_vm1, %v1498_v8 }
 0x2a7   : > { %1314 = vmatprep.subr.bf16.mxu1 %v1498_v8 }
 0x2ad   : > { %1305 = vmatmul.mubr.msk.bf16.vlgmr.msra.gmra.mxu1 %vm444_vm2, %v563_v31 }
 0x2ae   : > { %1316 = vmatprep.mubr.msk.bf16.mxu1 %vm1499_vm1, %v1498_v8  ;;  %1315 = vmatpush3.bf16.msra.mxu1 %v687_v19 }
 0x2af   : > { %1326 = vmatprep.subr.bf16.mxu1 %v1498_v8 }
 0x365   : > { %v485_v32 = vpop.f32.mrf.mxu1 }
 0x366   : > { %v491_v33 = vsel %vm444_vm2, %v485_v32, -inf }
 0x367   : > { %492 = vmax.xlane.f32.xlu1 %v491_v33  ;;  %v1294_v34 = vpop.f32.mrf.mxu1 }
 0x369   : > { %v488_v35 = vpop.f32.mrf.mxu1 }
 0x36b   : > { %v1295_v36 = vpop.f32.mrf.mxu1 }
 0x36d   : > { %v606_v37 = vpop.f32.mrf.mxu1 }
 0x36e   : > { %v612_v38 = vsel %vm444_vm2, %v606_v37, -inf }
 0x36f   : > { %613 = vmax.xlane.f32.xlu0 %v612_v38  ;;  %v1306_v39 = vpop.f32.mrf.mxu1 }
 0x371   : > { %v609_v40 = vpop.f32.mrf.mxu1 }
 0x373   : > { %v1307_v41 = vpop.f32.mrf.mxu1 }
 0x385   : > { %632 = vrot.lane.b32.xlu0 %v1639_v24, %s1503_s14 }
 0x3f0   : > { %v493_v42 = vpop.xlane.xlu1 %492 }
 0x3f1   : > { %v494_v43 = vsub.f32 %v485_v32, %v493_v42 }
 0x3f3   : > { %v495_v44 = vmul.f32 1.442695, %v494_v43 }
 0x3f5   : > { %1410 = vpow2.f32 %v495_v44 }
 0x3f8   : > { %v614_v45 = vpop.xlane.xlu0 %613 }
 0x3f9   : > { %v615_v46 = vsub.f32 %v606_v37, %v614_v45 }
 0x3fb   : > { %v616_v47 = vmul.f32 1.442695, %v615_v46 }
 0x3fc   : > { %v633_v58 = vpop.permute.xlu0 %632 }
 0x3fd   : > { %1412 = vpow2.f32 %v616_v47  ;;  %v638_v62 = vsel %vm516_vm3, %v633_v58, 0 }
 0x402   : > { %v1411_v48 = vpop.eup %1410 }
 0x403   : > { %v497_v49 = vsel %vm444_vm2, %v1411_v48, 0.0 }
 0x404   : > { %498 = vadd.xlane.f32.xlu1 %v497_v49 }
 0x40a   : > { %v1413_v50 = vpop.eup %1412 }
 0x40b   : > { %v618_v51 = vsel %vm444_vm2, %v1413_v50, 0.0 }
 0x40c   : > { %619 = vadd.xlane.f32.xlu1 %v618_v51 }
 0x41d   : > { %511 = vrot.lane.b32.xlu1 %v1639_v24, %s1504_s15 }
 0x421   : > { %777 = vrot.lane.b32.xlu1 %v1639_v24, %s1505_s16 }
 0x425   : > { %775 = vrot.lane.b32.xlu1 %v1639_v24, %s1506_s17 }
 0x48d   : > { %v499_v52 = vpop.xlane.xlu1 %498 }
 0x48e   : > { %1414 = vrcp.f32 %v499_v52 }
 0x495   : > { %v620_v53 = vpop.xlane.xlu1 %619 }
 0x496   : > { %1416 = vrcp.f32 %v620_v53 }
 0x499   : > { %v512_v54 = vpop.permute.xlu1 %511 }
 0x49a   : > { %v518_v55 = vsel %vm516_vm3, %v512_v54, 0 }
 0x49b   : > { %v1415_v56 = vpop.eup %1414  ;;  %1297 = vmatpush3.bf16.msra.mxu0 %v518_v55 }
 0x49c   : > { %1308 = vmatprep.subr.bf16.mxu0 %v1498_v8  ;;  %v501_v57 = vmul.f32 %v1415_v56, %v1411_v48 }
 0x49d   : > { %v778_v26 = vpop.permute.xlu1 %777 }
 0x49e   : > { %v502_v59 = vsel %vm444_vm2, %v501_v57, 0.0  ;;  %v510_v60 = vpack.c.bf16 %v501_v57, %v501_v57  ;;  %v783_v30 = vsel %vm444_vm2, %v778_v26, 0 }
 0x49f   : > { %v503_v61 = vrot.slane %v502_v59, 4 }
 0x4a0   : > { %1299 = vmatmul.mubr.msk.bf16.vlgmr.msra.gmra.mxu0 %vm444_vm2, %v510_v60 }
 0x4a1   : > { %v504_v63 = vadd.f32 %v503_v61, %v502_v59  ;;  %1309 = vmatpush3.bf16.msra.mxu0 %v638_v62  ;;  %1310 = vmatprep.mubr.msk.bf16.mxu0 %vm1499_vm1, %v1498_v8  ;;  %v776_v33 = vpop.permute.xlu1 %775 }
 0x4a2   : > { %1320 = vmatprep.subr.bf16.mxu0 %v1498_v8 }
 0x4a3   : > { %v1417_v0 = vpop.eup %1416  ;;  %v505_v2 = vrot.slane %v504_v63, 2 }
 0x4a4   : > { %v622_v1 = vmul.f32 %v1417_v0, %v1413_v50 }
 0x4a5   : > { %v506_v6 = vadd.f32 %v505_v2, %v504_v63 }
 0x4a6   : > { %v623_v3 = vsel %vm444_vm2, %v622_v1, 0.0  ;;  %v631_v4 = vpack.c.bf16 %v622_v1, %v622_v1 }
 0x4a7   : > { %v624_v5 = vrot.slane %v623_v3, 4  ;;  %v507_v10 = vrot.slane %v506_v6, 1 }
 0x4a8   : > { %1311 = vmatmul.mubr.msk.bf16.vlgmr.msra.gmra.mxu0 %vm444_vm2, %v631_v4 }
 0x4a9   : > { %v625_v7 = vadd.f32 %v624_v5, %v623_v3  ;;  %1322 = vmatprep.mubr.msk.bf16.mxu0 %vm1499_vm1, %v1498_v8  ;;  %v508_v13 = vadd.f32 %v507_v10, %v506_v6  ;;  %1321 = vmatpush3.bf16.msra.mxu0 %v733_v17  ;;  %v895_v6 = vld [vmem:[#allocation4 + $0x8] sm:$0xf] }
 0x4aa   : > { %1332 = vmatprep.subr.bf16.mxu0 %v1498_v8 }
 0x4ab   : > { %v626_v9 = vrot.slane %v625_v7, 2 }
 0x4ad   : > { %v627_v11 = vadd.f32 %v626_v9, %v625_v7  ;;  %v900_v7 = vsel %vm516_vm3, %v895_v6, 0 }
 0x4af   : > { %v628_v12 = vrot.slane %v627_v11, 1 }
 0x4b1   : > { %v629_v14 = vadd.f32 %v628_v12, %v627_v11 }
 0x4b3   : > { %v1675_v15 = vadd.f32 %v629_v14, %v508_v13 }
 0x560   : > { %v554_v20 = vpop.f32.mrf.mxu0 }
 0x561   : > { %v560_v21 = vpack.c.bf16 %v554_v20, %v554_v20 }
 0x562   : > { %v1300_v22 = vpop.f32.mrf.mxu0 }
 0x563   : > { %1323 = vmatmul.mubr.msk.bf16.vlgmr.msra.gmra.mxu0 %vm444_vm2, %v560_v21 }
 0x564   : > { %v557_v23 = vpop.f32.mrf.mxu0  ;;  %1334 = vmatprep.mubr.msk.bf16.mxu0 %vm1499_vm1, %v1498_v8 }
 0x566   : > { %v1301_v25 = vpop.f32.mrf.mxu0 }
 0x568   : > { %v674_v27 = vpop.f32.mrf.mxu0 }
 0x569   : > { %v680_v28 = vpack.c.bf16 %v674_v27, %v674_v27 }
 0x56a   : > { %v1312_v29 = vpop.f32.mrf.mxu0 }
 0x56b   : > { %1317 = vmatmul.mubr.msk.bf16.vlgmr.msra.gmra.mxu1 %vm444_vm2, %v680_v28  ;;  %v1063_v29 = vld [vmem:[#allocation4 + $0xc] sm:$0xf] }
 0x56c   : > { %1327 = vmatpush3.bf16.xpose.msra.mxu1 %v783_v30  ;;  %v677_v31 = vpop.f32.mrf.mxu0  ;;  %1328 = vmatprep.mubr.msk.bf16.mxu1 %vm1499_vm1, %v1498_v8  ;;  %v1068_v30 = vsel %vm516_vm3, %v1063_v29, 0 }
 0x56d   : > { %1338 = vmatprep.subr.bf16.mxu1 %v1498_v8 }
 0x56e   : > { %v1313_v32 = vpop.f32.mrf.mxu0 }
 0x573   : > { %1329 = vmatmul.mubr.msk.bf16.vlgmr.msra.gmra.mxu1 %vm444_vm2, %v776_v33 }
 0x574   : > { %1340 = vmatprep.mubr.msk.bf16.mxu1 %vm1499_vm1, %v1498_v8  ;;  %1339 = vmatpush3.bf16.msra.mxu1 %v900_v7 }
 0x575   : > { %1350 = vmatprep.subr.bf16.mxu1 %v1498_v8 }
 0x623   : > { %v769_v34 = vpop.f32.mrf.mxu0 }
 0x625   : > { %v1324_v35 = vpop.f32.mrf.mxu0 }
 0x627   : > { %v772_v36 = vpop.f32.mrf.mxu0 }
 0x629   : > { %v1325_v37 = vpop.f32.mrf.mxu0 }
 0x62b   : > { %v723_v38 = vpop.f32.mrf.mxu1 }
 0x62c   : > { %v1692_v39 = vadd.f32 %v769_v34, %v723_v38 }
 0x62d   : > { %v1318_v40 = vpop.f32.mrf.mxu1 }
 0x62f   : > { %v726_v41 = vpop.f32.mrf.mxu1 }
 0x631   : > { %v1319_v42 = vpop.f32.mrf.mxu1 }
 0x633   : > { %v819_v43 = vpop.f32.mrf.mxu1 }
 0x634   : > { %v825_v44 = vsel %vm444_vm2, %v819_v43, -inf }
 0x635   : > { %826 = vmax.xlane.f32.xlu1 %v825_v44  ;;  %v1330_v45 = vpop.f32.mrf.mxu1 }
 0x637   : > { %v822_v46 = vpop.f32.mrf.mxu1 }
 0x639   : > { %v1331_v47 = vpop.f32.mrf.mxu1 }
 0x646   : > { %845 = vrot.lane.b32.xlu1 %v1639_v24, %s1507_s18 }
 0x64a   : > { %943 = vrot.lane.b32.xlu1 %v1639_v24, %s1508_s19 }
 0x6be   : > { %v827_v48 = vpop.xlane.xlu1 %826 }
 0x6bf   : > { %v828_v49 = vsub.f32 %v819_v43, %v827_v48 }
 0x6c1   : > { %v829_v50 = vmul.f32 1.442695, %v828_v49 }
 0x6c2   : > { %v846_v51 = vpop.permute.xlu1 %845 }
 0x6c3   : > { %1418 = vpow2.f32 %v829_v50  ;;  %v851_v52 = vsel %vm516_vm3, %v846_v51, 0  ;;  %v1252_v51 = vld [vmem:[%s1747_s6] ss:$0 sm:$0xff] }
 0x6c4   : > { %1333 = vmatpush3.bf16.msra.mxu0 %v851_v52 }
 0x6c5   : > { %1344 = vmatprep.subr.bf16.mxu0 %v1498_v8 }
 0x6c6   : > { %v944_v2 = vpop.permute.xlu1 %943 }
 0x6d0   : > { %v1419_v53 = vpop.eup %1418 }
 0x6d1   : > { %v831_v54 = vsel %vm444_vm2, %v1419_v53, 0.0 }
 0x6d2   : > { %832 = vadd.xlane.f32.xlu0 %v831_v54 }
 0x6e8   : > { %945 = vrot.lane.b32.xlu0 %v1639_v24, %s1509_s20 }
 0x75b   : > { %v833_v55 = vpop.xlane.xlu0 %832 }
 0x75c   : > { %1420 = vrcp.f32 %v833_v55 }
 0x75f   : > { %v946_v58 = vpop.permute.xlu0 %945 }
 0x760   : > { %v951_v62 = vsel %vm444_vm2, %v946_v58, 0 }
 0x769   : > { %v1421_v56 = vpop.eup %1420 }
 0x76a   : > { %v835_v57 = vmul.f32 %v1421_v56, %v1419_v53 }
 0x76c   : > { %v836_v59 = vsel %vm444_vm2, %v835_v57, 0.0  ;;  %v844_v60 = vpack.c.bf16 %v835_v57, %v835_v57 }
 0x76d   : > { %v837_v61 = vrot.slane %v836_v59, 4 }
 0x76e   : > { %1335 = vmatmul.mubr.msk.bf16.vlgmr.msra.gmra.mxu0 %vm444_vm2, %v844_v60 }
 0x76f   : > { %v838_v63 = vadd.f32 %v837_v61, %v836_v59  ;;  %1345 = vmatpush3.bf16.xpose.msra.mxu0 %v951_v62  ;;  %1346 = vmatprep.mubr.msk.bf16.mxu0 %vm1499_vm1, %v1498_v8 }
 0x770   : > { %1356 = vmatprep.subr.bf16.mxu0 %v1498_v8 }
 0x771   : > { %v839_v0 = vrot.slane %v838_v63, 2 }
 0x773   : > { %v840_v1 = vadd.f32 %v839_v0, %v838_v63 }
 0x775   : > { %v841_v3 = vrot.slane %v840_v1, 1 }
 0x776   : > { %1347 = vmatmul.mubr.msk.bf16.vlgmr.msra.gmra.mxu0 %vm444_vm2, %v944_v2 }
 0x777   : > { %v842_v4 = vadd.f32 %v841_v3, %v840_v1  ;;  %1358 = vmatprep.mubr.msk.bf16.mxu0 %vm1499_vm1, %v1498_v8  ;;  %1357 = vmatpush3.bf16.msra.mxu0 %v1068_v30 }
 0x779   : > { %v843_v5 = vadd.f32 %v842_v4, %v1675_v15 }
 0x82e   : > { %v887_v9 = vpop.f32.mrf.mxu0 }
 0x82f   : > { %v893_v10 = vpack.c.bf16 %v887_v9, %v887_v9 }
 0x830   : > { %v1336_v11 = vpop.f32.mrf.mxu0 }
 0x831   : > { %1341 = vmatmul.mubr.msk.bf16.vlgmr.msra.gmra.mxu1 %vm444_vm2, %v893_v10 }
 0x832   : > { %v890_v12 = vpop.f32.mrf.mxu0  ;;  %1352 = vmatprep.mubr.msk.bf16.mxu1 %vm1499_vm1, %v1498_v8 }
 0x834   : > { %v1337_v13 = vpop.f32.mrf.mxu0 }
 0x836   : > { %v987_v14 = vpop.f32.mrf.mxu0 }
 0x837   : > { %v993_v16 = vsel %vm444_vm2, %v987_v14, -inf }
 0x838   : > { %994 = vmax.xlane.f32.xlu1 %v993_v16  ;;  %v1348_v15 = vpop.f32.mrf.mxu0 }
 0x83a   : > { %v990_v17 = vpop.f32.mrf.mxu0 }
 0x83c   : > { %v1349_v18 = vpop.f32.mrf.mxu0 }
 0x8c1   : > { %v995_v19 = vpop.xlane.xlu1 %994 }
 0x8c2   : > { %v996_v20 = vsub.f32 %v987_v14, %v995_v19 }
 0x8c4   : > { %v997_v21 = vmul.f32 1.442695, %v996_v20 }
 0x8c6   : > { %1422 = vpow2.f32 %v997_v21 }
 0x8d3   : > { %v1423_v22 = vpop.eup %1422 }
 0x8d4   : > { %v999_v23 = vsel %vm444_vm2, %v1423_v22, 0.0 }
 0x8d5   : > { %1000 = vadd.xlane.f32.xlu0 %v999_v23 }
 0x8eb   : > { %1013 = vrot.lane.b32.xlu0 %v1639_v24, %s1510_s22 }
 0x8f1   : > { %v936_v8 = vpop.f32.mrf.mxu1 }
 0x8f2   : > { %v942_v25 = vadd.f32 %v936_v8, %v1692_v39 }
 0x8f3   : > { %v1342_v26 = vpop.f32.mrf.mxu1 }
 0x8f5   : > { %v939_v27 = vpop.f32.mrf.mxu1 }
 0x8f7   : > { %v1343_v28 = vpop.f32.mrf.mxu1 }
 0x95e   : > { %v1001_v31 = vpop.xlane.xlu0 %1000 }
 0x95f   : > { %1424 = vrcp.f32 %v1001_v31 }
 0x962   : > { %v1014_v32 = vpop.permute.xlu0 %1013 }
 0x963   : > { %v1019_v33 = vsel %vm516_vm3, %v1014_v32, 0 }
 0x964   : > { %1351 = vmatpush3.bf16.msra.mxu1 %v1019_v33 }
 0x96c   : > { %v1425_v34 = vpop.eup %1424 }
 0x96d   : > { %v1003_v35 = vmul.f32 %v1425_v34, %v1423_v22 }
 0x96f   : > { %v1004_v24 = vsel %vm444_vm2, %v1003_v35, 0.0  ;;  %v1012_v36 = vpack.c.bf16 %v1003_v35, %v1003_v35 }
 0x970   : > { %v1005_v37 = vrot.slane %v1004_v24, 4 }
 0x971   : > { %1353 = vmatmul.mubr.msk.bf16.vlgmr.msra.gmra.mxu1 %vm444_vm2, %v1012_v36 }
 0x972   : > { %v1006_v38 = vadd.f32 %v1005_v37, %v1004_v24 }
 0x974   : > { %v1007_v39 = vrot.slane %v1006_v38, 2 }
 0x976   : > { %v1008_v40 = vadd.f32 %v1007_v39, %v1006_v38 }
 0x978   : > { %v1009_v41 = vrot.slane %v1008_v40, 1 }
 0x97a   : > { %v1010_v42 = vadd.f32 %v1009_v41, %v1008_v40 }
 0x97c   : > { %v1011_v43 = vadd.f32 %v1010_v42, %v843_v5 }
 0x97e   : > { %v1120_v44 = vmul.f32 0.25, %v1011_v43 }
 0x980   : > { %1122 = vst.msk [vmem:[%s339_s25] sm:$0x1] %vm1121_vm4, %v1120_v44 }
 0xa31   : > { %v1055_v45 = vpop.f32.mrf.mxu1 }
 0xa32   : > { %v1061_v46 = vpack.c.bf16 %v1055_v45, %v1055_v45 }
 0xa33   : > { %v1354_v47 = vpop.f32.mrf.mxu1 }
 0xa34   : > { %1359 = vmatmul.mubr.msk.bf16.vlgmr.msra.gmra.mxu0 %vm444_vm2, %v1061_v46 }
 0xa35   : > { %v1058_v48 = vpop.f32.mrf.mxu1 }
 0xa37   : > { %v1355_v49 = vpop.f32.mrf.mxu1 }
 0xaf4   : > { %v1104_v50 = vpop.f32.mrf.mxu0 }
 0xaf5   : > { %v1110_v52 = vadd.f32 %v1104_v50, %v942_v25 }
 0xaf6   : > { %v1360_v53 = vpop.f32.mrf.mxu0 }
 0xaf7   : > { %v1118_v54 = vadd.f32 %v1252_v51, %v1110_v52 }
 0xaf8   : > { %v1107_v55 = vpop.f32.mrf.mxu0 }
 0xaf9   : > { %1119 = vst.msk [vmem:[%s336_s10] sm:$0xff] %vm342_vm0, %v1118_v54 }
 0xafa   : > { %v1361_v56 = vpop.f32.mrf.mxu0 }
 0xafb PF: > { %s21_s27 = sadd.s32 1, %s1492_s27  }
 0xafc   : > { %p18_p2 = scmp.ge.s32.totalorder %s21_s27, 4  }
 0xafe   :  { %20 = sbr.rel (!%p18_p2) target bundleno = 2 (0x2), region = 102 }
 0xb03   :  { %1154 = vsyncpa [#allocation3], 1 }
 0xb04   :  { %1156 = vsyncpa [#allocation3 + $0x1], 1 }
 0xb05   :  { %1157 = vsyncpa [#allocation5], 1 }

</bundles_post_ra>
